<compile_context>
chip_gen: v5e
topology: v5e:2x2
jax: 0.10.0
libtpu: 0.0.40
codegen_flags: <defaults>
</compile_context>

<pallas_src>
import jax
import jax.numpy as jnp
import numpy as np
from jax.experimental import pallas as pl
from jax.experimental.pallas import tpu as pltpu


# ----------------------------- Pallas kernel --------------------------------

def _bilstm_kernel(xf_ref, xr_ref, wih_f_ref, wih_r_ref, whh_f_ref, whh_r_ref,
                   bf_ref, br_ref, lens_ref, of_ref, or_ref,
                   zf_ref, zr_ref, hf_ref, cf_ref, hr_ref, cr_ref):
    """One (batch-block, time-chunk) grid step of the fused bidirectional LSTM.

    xf_ref : (Tc, Bb, D)  forward-direction time chunk c
    xr_ref : (Tc, Bb, D)  reverse-direction time chunk (nc-1-c)
    wih_*  : (D, 4H)  input weights per direction, gate cols [i, f, o, g]
    whh_*  : (H, 4H)  recurrent weights per direction, same column layout
    b*_ref : (1, 4H)  combined bias (b_ih + b_hh) per direction
    lens   : (Bb, 1)  int32 sequence lengths for this batch block
    of/or  : (Tc, Bb, H) output chunks (forward half / reverse half)
    zf/zr  : (Tc, Bb, 4H) VMEM scratch: per-chunk input projections
    h*/c*  : (Bb, H)  VMEM scratch carrying the recurrence across time chunks
    """
    Tc, Bb, D = xf_ref.shape
    H = hf_ref.shape[1]
    c_idx = pl.program_id(1)
    nc = pl.num_programs(1)
    T = nc * Tc                          # padded total sequence length

    # ---- per-chunk hoisted input projection: lane-dense MXU GEMMs ----
    xf = xf_ref[...].reshape(Tc * Bb, D)
    xr = xr_ref[...].reshape(Tc * Bb, D)
    zf_ref[...] = (jnp.dot(xf, wih_f_ref[...],
                           preferred_element_type=jnp.float32)
                   + bf_ref[...]).reshape(Tc, Bb, 4 * H)
    zr_ref[...] = (jnp.dot(xr, wih_r_ref[...],
                           preferred_element_type=jnp.float32)
                   + br_ref[...]).reshape(Tc, Bb, 4 * H)

    # ---- state init at the first time chunk of this batch block ----
    @pl.when(c_idx == 0)
    def _():
        hf_ref[...] = jnp.zeros_like(hf_ref)
        cf_ref[...] = jnp.zeros_like(cf_ref)
        hr_ref[...] = jnp.zeros_like(hr_ref)
        cr_ref[...] = jnp.zeros_like(cr_ref)

    lens = lens_ref[...]                 # (Bb, 1) int32
    t0 = c_idx * Tc

    def cell(z, h_prev, c_prev, whh_ref, mask):
        # recurrent GEMM on the sequential critical path
        z = z + jnp.dot(h_prev, whh_ref[...],
                        preferred_element_type=jnp.float32)      # (Bb, 4H)
        # gate layout [i | f | o] sigmoid (one 3H EUP push), then g tanh
        sig = jax.nn.sigmoid(z[:, 0:3 * H])
        i_g = sig[:, 0:H]
        f_g = sig[:, H:2 * H]
        o_g = sig[:, 2 * H:3 * H]
        g_g = jnp.tanh(z[:, 3 * H:4 * H])
        c_new = f_g * c_prev + i_g * g_g
        h_new = o_g * jnp.tanh(c_new)
        # freeze state past the sequence length, zero the padded output
        c_out = jnp.where(mask, c_new, c_prev)
        h_out = jnp.where(mask, h_new, h_prev)
        y = jnp.where(mask, h_new, 0.0)
        return h_out, c_out, y

    def step(l, carry):
        t = t0 + l                       # global forward time
        rt = T - 1 - t                   # global reverse time
        lr = Tc - 1 - l                  # local row inside the reverse chunk

        # forward direction
        hf, cf, yf = cell(zf_ref[l], hf_ref[...], cf_ref[...],
                          whh_f_ref, lens > t)
        hf_ref[...] = hf
        cf_ref[...] = cf
        of_ref[l] = yf

        # reverse direction (time-reversed indexing, no gathers)
        hr, cr, yr = cell(zr_ref[lr], hr_ref[...], cr_ref[...],
                          whh_r_ref, lens > rt)
        hr_ref[...] = hr
        cr_ref[...] = cr
        or_ref[lr] = yr
        return carry

    # bounded unroll: LLO visibility without code blow-up at real T
    jax.lax.fori_loop(0, Tc, step, 0, unroll=min(8, Tc))


# --------------------------- VMEM budgeting ----------------------------------

def _ceil_to(v, m):
    return ((v + m - 1) // m) * m


def _padded_bytes(shape, itemsize=4):
    s = list(shape)
    s[-1] = _ceil_to(s[-1], 128)
    if len(s) >= 2:
        s[-2] = _ceil_to(s[-2], 8)
    n = 1
    for d in s:
        n *= d
    return n * itemsize


def _estimate_vmem(Tc, Bb, D, H):
    est = 0
    est += 2 * 2 * _padded_bytes((Tc, Bb, D))          # x chunks (fwd+rev, dbl-buffered)
    est += 2 * 2 * _padded_bytes((Tc, Bb, H))          # out chunks (fwd+rev, dbl-buffered)
    est += 2 * _padded_bytes((Tc, Bb, 4 * H))          # z_in scratch
    est += 2 * 2 * (_padded_bytes((D, 4 * H)) + _padded_bytes((H, 4 * H))
                    + _padded_bytes((1, 4 * H)))       # weights + bias
    est += 4 * _padded_bytes((Bb, H))                  # h/c state
    est += 2 * _padded_bytes((Bb, 1))                  # lengths
    return est


# ----------------------------- Module wrapper --------------------------------

def lstm_forward(x, n_wins, params, *, time_chunk=64, batch_block=None):
    """Equivalent of LSTM.forward(x, n_wins): returns (out, n_wins).

    x: (B, T, D) float32, n_wins: (B,) int with T == max(n_wins).
    out: (B, T, 2H) float32, zero-padded past each sequence length.
    time_chunk:  time steps per grid step (bounds VMEM; chunks are pipelined).
    batch_block: rows per batch block (multiple of 8, divides padded batch);
                 set Bp//2 on v7x to use both TensorCores.
    """
    B, T, D = x.shape
    H = params["H"]
    G = 4 * H
    lens = n_wins.astype(jnp.int32)

    # pad batch to a full sublane group; padded rows have length 0
    Bp = _ceil_to(B, 8)
    Bb = Bp if batch_block is None else int(batch_block)
    assert Bb % 8 == 0 and Bp % Bb == 0, "batch_block must be a multiple of 8 dividing the padded batch"
    nb = Bp // Bb

    # pad time to a multiple of the chunk size; masks keep padded steps inert
    Tc = max(1, min(int(time_chunk), T))
    nc = -(-T // Tc)
    T_pad = nc * Tc

    x_p = jnp.pad(x, ((0, Bp - B), (0, T_pad - T), (0, 0)))
    x_tbd = jnp.transpose(x_p, (1, 0, 2))              # (T_pad, Bp, D) time-major
    lens_p = jnp.pad(lens, (0, Bp - B))[:, None]       # (Bp, 1)

    vmem_limit = int(min(max(2 * _estimate_vmem(Tc, Bb, D, H), 32 << 20), 64 << 20))

    out_f, out_r = pl.pallas_call(
        _bilstm_kernel,
        out_shape=(jax.ShapeDtypeStruct((T_pad, Bp, H), jnp.float32),
                   jax.ShapeDtypeStruct((T_pad, Bp, H), jnp.float32)),
        grid_spec=pltpu.PrefetchScalarGridSpec(
            num_scalar_prefetch=0,
            grid=(nb, nc),
            in_specs=[
                # forward-end chunk and matching reverse-end chunk of x
                pl.BlockSpec((Tc, Bb, D), lambda j, c: (c, j, 0)),
                pl.BlockSpec((Tc, Bb, D), lambda j, c: (nc - 1 - c, j, 0)),
                pl.BlockSpec((D, G), lambda j, c: (0, 0)),     # W_ih fwd
                pl.BlockSpec((D, G), lambda j, c: (0, 0)),     # W_ih rev
                pl.BlockSpec((H, G), lambda j, c: (0, 0)),     # W_hh fwd
                pl.BlockSpec((H, G), lambda j, c: (0, 0)),     # W_hh rev
                pl.BlockSpec((1, G), lambda j, c: (0, 0)),     # bias fwd
                pl.BlockSpec((1, G), lambda j, c: (0, 0)),     # bias rev
                pl.BlockSpec((Bb, 1), lambda j, c: (j, 0)),    # lengths
            ],
            out_specs=(
                pl.BlockSpec((Tc, Bb, H), lambda j, c: (c, j, 0)),
                pl.BlockSpec((Tc, Bb, H), lambda j, c: (nc - 1 - c, j, 0)),
            ),
            scratch_shapes=[
                pltpu.VMEM((Tc, Bb, G), jnp.float32),          # z_in fwd chunk
                pltpu.VMEM((Tc, Bb, G), jnp.float32),          # z_in rev chunk
                pltpu.VMEM((Bb, H), jnp.float32),              # h fwd
                pltpu.VMEM((Bb, H), jnp.float32),              # c fwd
                pltpu.VMEM((Bb, H), jnp.float32),              # h rev
                pltpu.VMEM((Bb, H), jnp.float32),              # c rev
            ],
        ),
        compiler_params=pltpu.CompilerParams(
            dimension_semantics=("parallel", "arbitrary"),
            vmem_limit_bytes=vmem_limit,
        ),
    )(x_tbd, x_tbd,
      params["wih_f"], params["wih_r"],
      params["whh_f"], params["whh_r"],
      params["b_f"], params["b_r"],
      lens_p)

    out = jnp.concatenate([out_f, out_r], axis=-1)     # (T_pad, Bp, 2H)
    out = jnp.transpose(out, (1, 0, 2))[:B, :T]        # (B, T, 2H)
    return out, n_wins


# --------------------------- Parameter plumbing -------------------------------

def _per_direction_params(p, H):
    """Per-direction kernel weights with gate columns reordered [i, f, o, g]."""
    def reorder(wT):          # (..., 4H) torch order [i,f,g,o] -> [i,f,o,g]
        i = wT[..., 0 * H:1 * H]
        f = wT[..., 1 * H:2 * H]
        g = wT[..., 2 * H:3 * H]
        o = wT[..., 3 * H:4 * H]
        return jnp.concatenate([i, f, o, g], axis=-1)

    wih = reorder(p["w_ih"].T)                          # (D, 4H)
    whh = reorder(p["w_hh"].T)                          # (H, 4H)
    b = reorder((p["b_ih"] + p["b_hh"])[None, :])       # (1, 4H)
    return wih, whh, b


def init_lstm_params(key, input_size, lstm_h):
    """Deterministic synthetic parameters, PyTorch nn.LSTM shapes (1 layer, bidir)."""
    scale = 1.0 / np.sqrt(lstm_h)
    raw = []
    for _ in range(2):
        k1, k2, k3, k4, key = jax.random.split(key, 5)
        raw.append(dict(
            w_ih=jax.random.uniform(k1, (4 * lstm_h, input_size),
                                    minval=-scale, maxval=scale, dtype=jnp.float32),
            w_hh=jax.random.uniform(k2, (4 * lstm_h, lstm_h),
                                    minval=-scale, maxval=scale, dtype=jnp.float32),
            b_ih=jax.random.uniform(k3, (4 * lstm_h,),
                                    minval=-scale, maxval=scale, dtype=jnp.float32),
            b_hh=jax.random.uniform(k4, (4 * lstm_h,),
                                    minval=-scale, maxval=scale, dtype=jnp.float32),
        ))
    wih_f, whh_f, b_f = _per_direction_params(raw[0], lstm_h)
    wih_r, whh_r, b_r = _per_direction_params(raw[1], lstm_h)
    return dict(H=lstm_h, raw=raw,
                wih_f=wih_f, wih_r=wih_r, whh_f=whh_f, whh_r=whh_r,
                b_f=b_f, b_r=b_r)


# ----------------------------- Pure-JAX reference ----------------------------

def _reverse_within_lengths(x_btX, lens):
    """Reverse each sequence within its valid length along axis=1."""
    T = x_btX.shape[1]
    t_idx = jnp.arange(T, dtype=jnp.int32)[None, :]
    rev = jnp.where(t_idx < lens[:, None], lens[:, None] - 1 - t_idx, t_idx)
    return jnp.take_along_axis(x_btX, rev[:, :, None], axis=1)


def _lstm_unidir_ref(x_btd, lens, p):
    B, T, D = x_btd.shape
    H = p["w_hh"].shape[1]
    wihT = p["w_ih"].T
    whhT = p["w_hh"].T
    bias = (p["b_ih"] + p["b_hh"])[None, :]
    h0 = jnp.zeros((B, H), jnp.float32)
    c0 = jnp.zeros((B, H), jnp.float32)

    def step(carry, inp):
        h, c = carry
        x_t, t = inp
        z = x_t @ wihT + h @ whhT + bias
        i = jax.nn.sigmoid(z[:, 0:H]); f = jax.nn.sigmoid(z[:, H:2 * H])
        g = jnp.tanh(z[:, 2 * H:3 * H]); o = jax.nn.sigmoid(z[:, 3 * H:4 * H])
        c_new = f * c + i * g
        h_new = o * jnp.tanh(c_new)
        m = (lens > t)[:, None]
        c = jnp.where(m, c_new, c)
        h = jnp.where(m, h_new, h)
        return (h, c), jnp.where(m, h_new, 0.0)

    _, ys = jax.lax.scan(step, (h0, c0),
                         (jnp.transpose(x_btd, (1, 0, 2)),
                          jnp.arange(T, dtype=jnp.int32)))
    return jnp.transpose(ys, (1, 0, 2))


def lstm_forward_ref(x, n_wins, params):
    lens = n_wins.astype(jnp.int32)
    out_f = _lstm_unidir_ref(x, lens, params["raw"][0])
    x_r = _reverse_within_lengths(x, lens)
    out_r = _lstm_unidir_ref(x_r, lens, params["raw"][1])
    out_r = _reverse_within_lengths(out_r, lens)
    return jnp.concatenate([out_f, out_r], axis=-1), n_wins


# ----------------------------------- Main ------------------------------------

if __name__ == "__main__":
    B, T, D, H = 4, 8, 16, 32   # batch, seq (n_wins.max()), input_size, lstm_h

    key = jax.random.PRNGKey(0)
    kx, kp = jax.random.split(key)
    x = jax.random.normal(kx, (B, T, D), dtype=jnp.float32)
    n_wins = jnp.array([8, 5, 3, 7], dtype=jnp.int32)

    params = init_lstm_params(kp, input_size=D, lstm_h=H)

    # time_chunk=5 deliberately exercises multi-chunk carry AND time padding
    out, n_out = lstm_forward(x, n_wins, params, time_chunk=5)
    out = jax.block_until_ready(out)

    out_ref, _ = lstm_forward_ref(x, n_wins, params)
    np.testing.assert_allclose(np.asarray(out), np.asarray(out_ref),
                               rtol=1e-4, atol=1e-4)
    assert out.shape == (B, T, 2 * H)
    # padded positions must be exactly zero
    t_idx = np.arange(T)[None, :]
    pad_mask = t_idx >= np.asarray(n_wins)[:, None]
    assert np.all(np.asarray(out)[pad_mask] == 0.0)

    print("KERNEL_OK")
</pallas_src>

<mosaic_0001>
module attributes {stable_mosaic.version = 11 : i64} {
  func.func @_bilstm_kernel(%arg0: i32, %arg1: i32, %arg2: memref<5x8x16xf32, #tpu.memory_space<vmem>>, %arg3: memref<5x8x16xf32, #tpu.memory_space<vmem>>, %arg4: memref<16x128xf32, #tpu.memory_space<vmem>>, %arg5: memref<16x128xf32, #tpu.memory_space<vmem>>, %arg6: memref<32x128xf32, #tpu.memory_space<vmem>>, %arg7: memref<32x128xf32, #tpu.memory_space<vmem>>, %arg8: memref<1x128xf32, #tpu.memory_space<vmem>>, %arg9: memref<1x128xf32, #tpu.memory_space<vmem>>, %arg10: memref<8x1xi32, #tpu.memory_space<vmem>>, %arg11: memref<5x8x32xf32, #tpu.memory_space<vmem>>, %arg12: memref<5x8x32xf32, #tpu.memory_space<vmem>>, %arg13: memref<5x8x128xf32, #tpu.memory_space<vmem>>, %arg14: memref<5x8x128xf32, #tpu.memory_space<vmem>>, %arg15: memref<8x32xf32, #tpu.memory_space<vmem>>, %arg16: memref<8x32xf32, #tpu.memory_space<vmem>>, %arg17: memref<8x32xf32, #tpu.memory_space<vmem>>, %arg18: memref<8x32xf32, #tpu.memory_space<vmem>>) attributes {dimension_semantics = [#tpu.dimension_semantics<parallel>, #tpu.dimension_semantics<arbitrary>], iteration_bounds = array<i64: 1, 2>, scalar_prefetch = 0 : i64, scratch_operands = 6 : i64, tpu.core_type = #tpu.core_type<tc>, window_params = [{transform_indices = @transform_0, window_bounds = array<i64: 5, 8, 16>}, {transform_indices = @transform_1, window_bounds = array<i64: 5, 8, 16>}, {pipeline_mode = #tpu.pipeline_mode<synchronous>, transform_indices = @transform_2, window_bounds = array<i64: 16, 128>}, {pipeline_mode = #tpu.pipeline_mode<synchronous>, transform_indices = @transform_3, window_bounds = array<i64: 16, 128>}, {pipeline_mode = #tpu.pipeline_mode<synchronous>, transform_indices = @transform_4, window_bounds = array<i64: 32, 128>}, {pipeline_mode = #tpu.pipeline_mode<synchronous>, transform_indices = @transform_5, window_bounds = array<i64: 32, 128>}, {pipeline_mode = #tpu.pipeline_mode<synchronous>, transform_indices = @transform_6, window_bounds = array<i64: 1, 128>}, {pipeline_mode = #tpu.pipeline_mode<synchronous>, transform_indices = @transform_7, window_bounds = array<i64: 1, 128>}, {transform_indices = @transform_8, window_bounds = array<i64: 8, 1>}, {transform_indices = @transform_9, window_bounds = array<i64: 5, 8, 32>}, {transform_indices = @transform_10, window_bounds = array<i64: 5, 8, 32>}]} {
    %c0 = arith.constant 0 : index
    %c0_0 = arith.constant 0 : index
    %c0_1 = arith.constant 0 : index
    %0 = vector.load %arg2[%c0, %c0_0, %c0_1] : memref<5x8x16xf32, #tpu.memory_space<vmem>>, vector<5x8x16xf32>
    %1 = vector.shape_cast %0 : vector<5x8x16xf32> to vector<40x16xf32>
    %c0_2 = arith.constant 0 : index
    %c0_3 = arith.constant 0 : index
    %c0_4 = arith.constant 0 : index
    %2 = vector.load %arg3[%c0_2, %c0_3, %c0_4] : memref<5x8x16xf32, #tpu.memory_space<vmem>>, vector<5x8x16xf32>
    %3 = vector.shape_cast %2 : vector<5x8x16xf32> to vector<40x16xf32>
    %c0_5 = arith.constant 0 : index
    %c0_6 = arith.constant 0 : index
    %4 = vector.load %arg4[%c0_5, %c0_6] : memref<16x128xf32, #tpu.memory_space<vmem>>, vector<16x128xf32>
    %cst = arith.constant dense<0.000000e+00> : vector<40x128xf32>
    %5 = tpu.matmul %1, %4, %cst {dimension_numbers = #tpu.dot_dimension_numbers<[1], [0], [0], [1], [0, 0, 1, 1], [], []>} : vector<40x16xf32>, vector<16x128xf32>, vector<40x128xf32> -> vector<40x128xf32>
    %c0_7 = arith.constant 0 : index
    %c0_8 = arith.constant 0 : index
    %6 = vector.load %arg8[%c0_7, %c0_8] : memref<1x128xf32, #tpu.memory_space<vmem>>, vector<1x128xf32>
    %7 = vector.broadcast %6 : vector<1x128xf32> to vector<40x128xf32>
    %8 = arith.addf %5, %7 : vector<40x128xf32>
    %9 = vector.shape_cast %8 : vector<40x128xf32> to vector<5x8x128xf32>
    %c0_9 = arith.constant 0 : index
    %c0_10 = arith.constant 0 : index
    %c0_11 = arith.constant 0 : index
    %10 = vector.load %arg13[%c0_9, %c0_10, %c0_11] : memref<5x8x128xf32, #tpu.memory_space<vmem>>, vector<5x8x128xf32>
    tpu.vector_store %arg13[%c0_9, %c0_10, %c0_11], %9 {strides = array<i32>} : memref<5x8x128xf32, #tpu.memory_space<vmem>>, vector<5x8x128xf32>,
    %c0_12 = arith.constant 0 : index
    %c0_13 = arith.constant 0 : index
    %11 = vector.load %arg5[%c0_12, %c0_13] : memref<16x128xf32, #tpu.memory_space<vmem>>, vector<16x128xf32>
    %cst_14 = arith.constant dense<0.000000e+00> : vector<40x128xf32>
    %12 = tpu.matmul %3, %11, %cst_14 {dimension_numbers = #tpu.dot_dimension_numbers<[1], [0], [0], [1], [0, 0, 1, 1], [], []>} : vector<40x16xf32>, vector<16x128xf32>, vector<40x128xf32> -> vector<40x128xf32>
    %c0_15 = arith.constant 0 : index
    %c0_16 = arith.constant 0 : index
    %13 = vector.load %arg9[%c0_15, %c0_16] : memref<1x128xf32, #tpu.memory_space<vmem>>, vector<1x128xf32>
    %14 = vector.broadcast %13 : vector<1x128xf32> to vector<40x128xf32>
    %15 = arith.addf %12, %14 : vector<40x128xf32>
    %16 = vector.shape_cast %15 : vector<40x128xf32> to vector<5x8x128xf32>
    %c0_17 = arith.constant 0 : index
    %c0_18 = arith.constant 0 : index
    %c0_19 = arith.constant 0 : index
    %17 = vector.load %arg14[%c0_17, %c0_18, %c0_19] : memref<5x8x128xf32, #tpu.memory_space<vmem>>, vector<5x8x128xf32>
    tpu.vector_store %arg14[%c0_17, %c0_18, %c0_19], %16 {strides = array<i32>} : memref<5x8x128xf32, #tpu.memory_space<vmem>>, vector<5x8x128xf32>,
    %c0_i32 = arith.constant 0 : i32
    %18 = arith.cmpi eq, %arg1, %c0_i32 : i32
    %19 = arith.extui %18 : i1 to i32
    %c0_i32_20 = arith.constant 0 : i32
    %20 = arith.cmpi ne, %19, %c0_i32_20 : i32
    scf.if %20 {
      %cst_204 = arith.constant 0.000000e+00 : f32
      %458 = vector.broadcast %cst_204 : f32 to vector<8x32xf32>
      %c0_205 = arith.constant 0 : index
      %c0_206 = arith.constant 0 : index
      %459 = vector.load %arg15[%c0_205, %c0_206] : memref<8x32xf32, #tpu.memory_space<vmem>>, vector<8x32xf32>
      tpu.vector_store %arg15[%c0_205, %c0_206], %458 {strides = array<i32>} : memref<8x32xf32, #tpu.memory_space<vmem>>, vector<8x32xf32>,
      %cst_207 = arith.constant 0.000000e+00 : f32
      %460 = vector.broadcast %cst_207 : f32 to vector<8x32xf32>
      %c0_208 = arith.constant 0 : index
      %c0_209 = arith.constant 0 : index
      %461 = vector.load %arg16[%c0_208, %c0_209] : memref<8x32xf32, #tpu.memory_space<vmem>>, vector<8x32xf32>
      tpu.vector_store %arg16[%c0_208, %c0_209], %460 {strides = array<i32>} : memref<8x32xf32, #tpu.memory_space<vmem>>, vector<8x32xf32>,
      %cst_210 = arith.constant 0.000000e+00 : f32
      %462 = vector.broadcast %cst_210 : f32 to vector<8x32xf32>
      %c0_211 = arith.constant 0 : index
      %c0_212 = arith.constant 0 : index
      %463 = vector.load %arg17[%c0_211, %c0_212] : memref<8x32xf32, #tpu.memory_space<vmem>>, vector<8x32xf32>
      tpu.vector_store %arg17[%c0_211, %c0_212], %462 {strides = array<i32>} : memref<8x32xf32, #tpu.memory_space<vmem>>, vector<8x32xf32>,
      %cst_213 = arith.constant 0.000000e+00 : f32
      %464 = vector.broadcast %cst_213 : f32 to vector<8x32xf32>
      %c0_214 = arith.constant 0 : index
      %c0_215 = arith.constant 0 : index
      %465 = vector.load %arg18[%c0_214, %c0_215] : memref<8x32xf32, #tpu.memory_space<vmem>>, vector<8x32xf32>
      tpu.vector_store %arg18[%c0_214, %c0_215], %464 {strides = array<i32>} : memref<8x32xf32, #tpu.memory_space<vmem>>, vector<8x32xf32>,
    } else {
    }
    %c0_21 = arith.constant 0 : index
    %c0_22 = arith.constant 0 : index
    %21 = vector.load %arg10[%c0_21, %c0_22] : memref<8x1xi32, #tpu.memory_space<vmem>>, vector<8x1xi32>
    %c5_i32 = arith.constant 5 : i32
    %22 = arith.muli %arg1, %c5_i32 : i32
    %c0_i32_23 = arith.constant 0 : i32
    %23 = arith.addi %22, %c0_i32_23 : i32
    %c9_i32 = arith.constant 9 : i32
    %24 = arith.subi %c9_i32, %23 : i32
    %c4_i32 = arith.constant 4 : i32
    %25 = arith.subi %c4_i32, %c0_i32_23 : i32
    %26 = arith.index_cast %c0_i32_23 : i32 to index
    %c0_24 = arith.constant 0 : index
    %c0_25 = arith.constant 0 : index
    %27 = vector.load %arg13[%26, %c0_24, %c0_25] : memref<5x8x128xf32, #tpu.memory_space<vmem>>, vector<1x8x128xf32>
    %28 = vector.shape_cast %27 : vector<1x8x128xf32> to vector<8x128xf32>
    %c0_26 = arith.constant 0 : index
    %c0_27 = arith.constant 0 : index
    %29 = vector.load %arg15[%c0_26, %c0_27] : memref<8x32xf32, #tpu.memory_space<vmem>>, vector<8x32xf32>
    %c0_28 = arith.constant 0 : index
    %c0_29 = arith.constant 0 : index
    %30 = vector.load %arg16[%c0_28, %c0_29] : memref<8x32xf32, #tpu.memory_space<vmem>>, vector<8x32xf32>
    %31 = vector.broadcast %23 : i32 to vector<8x1xi32>
    %32 = arith.cmpi sgt, %21, %31 : vector<8x1xi32>
    %c0_30 = arith.constant 0 : index
    %c0_31 = arith.constant 0 : index
    %33 = vector.load %arg6[%c0_30, %c0_31] : memref<32x128xf32, #tpu.memory_space<vmem>>, vector<32x128xf32>
    %cst_32 = arith.constant dense<0.000000e+00> : vector<8x128xf32>
    %34 = tpu.matmul %29, %33, %cst_32 {dimension_numbers = #tpu.dot_dimension_numbers<[1], [0], [0], [1], [0, 0, 1, 1], [], []>} : vector<8x32xf32>, vector<32x128xf32>, vector<8x128xf32> -> vector<8x128xf32>
    %35 = arith.addf %28, %34 : vector<8x128xf32>
    %36 = vector.extract_strided_slice %35 {offsets = [0, 0], sizes = [8, 96], strides = [1, 1]} : vector<8x128xf32> to vector<8x96xf32>
    %37 = arith.negf %36 : vector<8x96xf32>
    %38 = math.exp %37 : vector<8x96xf32>
    %cst_33 = arith.constant 1.000000e+00 : f32
    %39 = vector.broadcast %cst_33 : f32 to vector<8x96xf32>
    %40 = arith.addf %39, %38 : vector<8x96xf32>
    %41 = arith.divf %39, %40 : vector<8x96xf32>
    %42 = vector.extract_strided_slice %41 {offsets = [0, 0], sizes = [8, 32], strides = [1, 1]} : vector<8x96xf32> to vector<8x32xf32>
    %43 = vector.extract_strided_slice %41 {offsets = [0, 32], sizes = [8, 32], strides = [1, 1]} : vector<8x96xf32> to vector<8x32xf32>
    %44 = vector.extract_strided_slice %41 {offsets = [0, 64], sizes = [8, 32], strides = [1, 1]} : vector<8x96xf32> to vector<8x32xf32>
    %45 = vector.extract_strided_slice %35 {offsets = [0, 96], sizes = [8, 32], strides = [1, 1]} : vector<8x128xf32> to vector<8x32xf32>
    %46 = math.tanh %45 : vector<8x32xf32>
    %47 = arith.mulf %43, %30 : vector<8x32xf32>
    %48 = arith.mulf %42, %46 : vector<8x32xf32>
    %49 = arith.addf %47, %48 : vector<8x32xf32>
    %50 = math.tanh %49 : vector<8x32xf32>
    %51 = arith.mulf %44, %50 : vector<8x32xf32>
    %52 = vector.shape_cast %32 : vector<8x1xi1> to vector<8x1xi1>
    %53 = vector.broadcast %52 : vector<8x1xi1> to vector<8x32xi1>
    %54 = arith.select %53, %49, %30 : vector<8x32xi1>, vector<8x32xf32>
    %55 = vector.shape_cast %32 : vector<8x1xi1> to vector<8x1xi1>
    %56 = vector.broadcast %55 : vector<8x1xi1> to vector<8x32xi1>
    %57 = arith.select %56, %51, %29 : vector<8x32xi1>, vector<8x32xf32>
    %cst_34 = arith.constant 0.000000e+00 : f32
    %58 = vector.shape_cast %32 : vector<8x1xi1> to vector<8x1xi1>
    %59 = vector.broadcast %58 : vector<8x1xi1> to vector<8x32xi1>
    %60 = vector.broadcast %cst_34 : f32 to vector<8x32xf32>
    %61 = arith.select %59, %51, %60 : vector<8x32xi1>, vector<8x32xf32>
    %c0_35 = arith.constant 0 : index
    %c0_36 = arith.constant 0 : index
    %62 = vector.load %arg15[%c0_35, %c0_36] : memref<8x32xf32, #tpu.memory_space<vmem>>, vector<8x32xf32>
    tpu.vector_store %arg15[%c0_35, %c0_36], %57 {strides = array<i32>} : memref<8x32xf32, #tpu.memory_space<vmem>>, vector<8x32xf32>,
    %c0_37 = arith.constant 0 : index
    %c0_38 = arith.constant 0 : index
    %63 = vector.load %arg16[%c0_37, %c0_38] : memref<8x32xf32, #tpu.memory_space<vmem>>, vector<8x32xf32>
    tpu.vector_store %arg16[%c0_37, %c0_38], %54 {strides = array<i32>} : memref<8x32xf32, #tpu.memory_space<vmem>>, vector<8x32xf32>,
    %64 = arith.index_cast %c0_i32_23 : i32 to index
    %c0_39 = arith.constant 0 : index
    %c0_40 = arith.constant 0 : index
    %65 = vector.load %arg11[%64, %c0_39, %c0_40] : memref<5x8x32xf32, #tpu.memory_space<vmem>>, vector<1x8x32xf32>
    %66 = vector.shape_cast %65 : vector<1x8x32xf32> to vector<8x32xf32>
    %67 = vector.shape_cast %61 : vector<8x32xf32> to vector<1x8x32xf32>
    tpu.vector_store %arg11[%64, %c0_39, %c0_40], %67 {strides = array<i32>} : memref<5x8x32xf32, #tpu.memory_space<vmem>>, vector<1x8x32xf32>,
    %68 = arith.index_cast %25 : i32 to index
    %c0_41 = arith.constant 0 : index
    %c0_42 = arith.constant 0 : index
    %69 = vector.load %arg14[%68, %c0_41, %c0_42] : memref<5x8x128xf32, #tpu.memory_space<vmem>>, vector<1x8x128xf32>
    %70 = vector.shape_cast %69 : vector<1x8x128xf32> to vector<8x128xf32>
    %c0_43 = arith.constant 0 : index
    %c0_44 = arith.constant 0 : index
    %71 = vector.load %arg17[%c0_43, %c0_44] : memref<8x32xf32, #tpu.memory_space<vmem>>, vector<8x32xf32>
    %c0_45 = arith.constant 0 : index
    %c0_46 = arith.constant 0 : index
    %72 = vector.load %arg18[%c0_45, %c0_46] : memref<8x32xf32, #tpu.memory_space<vmem>>, vector<8x32xf32>
    %73 = vector.broadcast %24 : i32 to vector<8x1xi32>
    %74 = arith.cmpi sgt, %21, %73 : vector<8x1xi32>
    %c0_47 = arith.constant 0 : index
    %c0_48 = arith.constant 0 : index
    %75 = vector.load %arg7[%c0_47, %c0_48] : memref<32x128xf32, #tpu.memory_space<vmem>>, vector<32x128xf32>
    %cst_49 = arith.constant dense<0.000000e+00> : vector<8x128xf32>
    %76 = tpu.matmul %71, %75, %cst_49 {dimension_numbers = #tpu.dot_dimension_numbers<[1], [0], [0], [1], [0, 0, 1, 1], [], []>} : vector<8x32xf32>, vector<32x128xf32>, vector<8x128xf32> -> vector<8x128xf32>
    %77 = arith.addf %70, %76 : vector<8x128xf32>
    %78 = vector.extract_strided_slice %77 {offsets = [0, 0], sizes = [8, 96], strides = [1, 1]} : vector<8x128xf32> to vector<8x96xf32>
    %79 = arith.negf %78 : vector<8x96xf32>
    %80 = math.exp %79 : vector<8x96xf32>
    %cst_50 = arith.constant 1.000000e+00 : f32
    %81 = vector.broadcast %cst_50 : f32 to vector<8x96xf32>
    %82 = arith.addf %81, %80 : vector<8x96xf32>
    %83 = arith.divf %81, %82 : vector<8x96xf32>
    %84 = vector.extract_strided_slice %83 {offsets = [0, 0], sizes = [8, 32], strides = [1, 1]} : vector<8x96xf32> to vector<8x32xf32>
    %85 = vector.extract_strided_slice %83 {offsets = [0, 32], sizes = [8, 32], strides = [1, 1]} : vector<8x96xf32> to vector<8x32xf32>
    %86 = vector.extract_strided_slice %83 {offsets = [0, 64], sizes = [8, 32], strides = [1, 1]} : vector<8x96xf32> to vector<8x32xf32>
    %87 = vector.extract_strided_slice %77 {offsets = [0, 96], sizes = [8, 32], strides = [1, 1]} : vector<8x128xf32> to vector<8x32xf32>
    %88 = math.tanh %87 : vector<8x32xf32>
    %89 = arith.mulf %85, %72 : vector<8x32xf32>
    %90 = arith.mulf %84, %88 : vector<8x32xf32>
    %91 = arith.addf %89, %90 : vector<8x32xf32>
    %92 = math.tanh %91 : vector<8x32xf32>
    %93 = arith.mulf %86, %92 : vector<8x32xf32>
    %94 = vector.shape_cast %74 : vector<8x1xi1> to vector<8x1xi1>
    %95 = vector.broadcast %94 : vector<8x1xi1> to vector<8x32xi1>
    %96 = arith.select %95, %91, %72 : vector<8x32xi1>, vector<8x32xf32>
    %97 = vector.shape_cast %74 : vector<8x1xi1> to vector<8x1xi1>
    %98 = vector.broadcast %97 : vector<8x1xi1> to vector<8x32xi1>
    %99 = arith.select %98, %93, %71 : vector<8x32xi1>, vector<8x32xf32>
    %cst_51 = arith.constant 0.000000e+00 : f32
    %100 = vector.shape_cast %74 : vector<8x1xi1> to vector<8x1xi1>
    %101 = vector.broadcast %100 : vector<8x1xi1> to vector<8x32xi1>
    %102 = vector.broadcast %cst_51 : f32 to vector<8x32xf32>
    %103 = arith.select %101, %93, %102 : vector<8x32xi1>, vector<8x32xf32>
    %c0_52 = arith.constant 0 : index
    %c0_53 = arith.constant 0 : index
    %104 = vector.load %arg17[%c0_52, %c0_53] : memref<8x32xf32, #tpu.memory_space<vmem>>, vector<8x32xf32>
    tpu.vector_store %arg17[%c0_52, %c0_53], %99 {strides = array<i32>} : memref<8x32xf32, #tpu.memory_space<vmem>>, vector<8x32xf32>,
    %c0_54 = arith.constant 0 : index
    %c0_55 = arith.constant 0 : index
    %105 = vector.load %arg18[%c0_54, %c0_55] : memref<8x32xf32, #tpu.memory_space<vmem>>, vector<8x32xf32>
    tpu.vector_store %arg18[%c0_54, %c0_55], %96 {strides = array<i32>} : memref<8x32xf32, #tpu.memory_space<vmem>>, vector<8x32xf32>,
    %106 = arith.index_cast %25 : i32 to index
    %c0_56 = arith.constant 0 : index
    %c0_57 = arith.constant 0 : index
    %107 = vector.load %arg12[%106, %c0_56, %c0_57] : memref<5x8x32xf32, #tpu.memory_space<vmem>>, vector<1x8x32xf32>
    %108 = vector.shape_cast %107 : vector<1x8x32xf32> to vector<8x32xf32>
    %109 = vector.shape_cast %103 : vector<8x32xf32> to vector<1x8x32xf32>
    tpu.vector_store %arg12[%106, %c0_56, %c0_57], %109 {strides = array<i32>} : memref<5x8x32xf32, #tpu.memory_space<vmem>>, vector<1x8x32xf32>,
    %c1_i32 = arith.constant 1 : i32
    %110 = arith.addi %22, %c1_i32 : i32
    %c9_i32_58 = arith.constant 9 : i32
    %111 = arith.subi %c9_i32_58, %110 : i32
    %c4_i32_59 = arith.constant 4 : i32
    %112 = arith.subi %c4_i32_59, %c1_i32 : i32
    %113 = arith.index_cast %c1_i32 : i32 to index
    %c0_60 = arith.constant 0 : index
    %c0_61 = arith.constant 0 : index
    %114 = vector.load %arg13[%113, %c0_60, %c0_61] : memref<5x8x128xf32, #tpu.memory_space<vmem>>, vector<1x8x128xf32>
    %115 = vector.shape_cast %114 : vector<1x8x128xf32> to vector<8x128xf32>
    %c0_62 = arith.constant 0 : index
    %c0_63 = arith.constant 0 : index
    %116 = vector.load %arg15[%c0_62, %c0_63] : memref<8x32xf32, #tpu.memory_space<vmem>>, vector<8x32xf32>
    %c0_64 = arith.constant 0 : index
    %c0_65 = arith.constant 0 : index
    %117 = vector.load %arg16[%c0_64, %c0_65] : memref<8x32xf32, #tpu.memory_space<vmem>>, vector<8x32xf32>
    %118 = vector.broadcast %110 : i32 to vector<8x1xi32>
    %119 = arith.cmpi sgt, %21, %118 : vector<8x1xi32>
    %c0_66 = arith.constant 0 : index
    %c0_67 = arith.constant 0 : index
    %120 = vector.load %arg6[%c0_66, %c0_67] : memref<32x128xf32, #tpu.memory_space<vmem>>, vector<32x128xf32>
    %cst_68 = arith.constant dense<0.000000e+00> : vector<8x128xf32>
    %121 = tpu.matmul %116, %120, %cst_68 {dimension_numbers = #tpu.dot_dimension_numbers<[1], [0], [0], [1], [0, 0, 1, 1], [], []>} : vector<8x32xf32>, vector<32x128xf32>, vector<8x128xf32> -> vector<8x128xf32>
    %122 = arith.addf %115, %121 : vector<8x128xf32>
    %123 = vector.extract_strided_slice %122 {offsets = [0, 0], sizes = [8, 96], strides = [1, 1]} : vector<8x128xf32> to vector<8x96xf32>
    %124 = arith.negf %123 : vector<8x96xf32>
    %125 = math.exp %124 : vector<8x96xf32>
    %cst_69 = arith.constant 1.000000e+00 : f32
    %126 = vector.broadcast %cst_69 : f32 to vector<8x96xf32>
    %127 = arith.addf %126, %125 : vector<8x96xf32>
    %128 = arith.divf %126, %127 : vector<8x96xf32>
    %129 = vector.extract_strided_slice %128 {offsets = [0, 0], sizes = [8, 32], strides = [1, 1]} : vector<8x96xf32> to vector<8x32xf32>
    %130 = vector.extract_strided_slice %128 {offsets = [0, 32], sizes = [8, 32], strides = [1, 1]} : vector<8x96xf32> to vector<8x32xf32>
    %131 = vector.extract_strided_slice %128 {offsets = [0, 64], sizes = [8, 32], strides = [1, 1]} : vector<8x96xf32> to vector<8x32xf32>
    %132 = vector.extract_strided_slice %122 {offsets = [0, 96], sizes = [8, 32], strides = [1, 1]} : vector<8x128xf32> to vector<8x32xf32>
    %133 = math.tanh %132 : vector<8x32xf32>
    %134 = arith.mulf %130, %117 : vector<8x32xf32>
    %135 = arith.mulf %129, %133 : vector<8x32xf32>
    %136 = arith.addf %134, %135 : vector<8x32xf32>
    %137 = math.tanh %136 : vector<8x32xf32>
    %138 = arith.mulf %131, %137 : vector<8x32xf32>
    %139 = vector.shape_cast %119 : vector<8x1xi1> to vector<8x1xi1>
    %140 = vector.broadcast %139 : vector<8x1xi1> to vector<8x32xi1>
    %141 = arith.select %140, %136, %117 : vector<8x32xi1>, vector<8x32xf32>
    %142 = vector.shape_cast %119 : vector<8x1xi1> to vector<8x1xi1>
    %143 = vector.broadcast %142 : vector<8x1xi1> to vector<8x32xi1>
    %144 = arith.select %143, %138, %116 : vector<8x32xi1>, vector<8x32xf32>
    %cst_70 = arith.constant 0.000000e+00 : f32
    %145 = vector.shape_cast %119 : vector<8x1xi1> to vector<8x1xi1>
    %146 = vector.broadcast %145 : vector<8x1xi1> to vector<8x32xi1>
    %147 = vector.broadcast %cst_70 : f32 to vector<8x32xf32>
    %148 = arith.select %146, %138, %147 : vector<8x32xi1>, vector<8x32xf32>
    %c0_71 = arith.constant 0 : index
    %c0_72 = arith.constant 0 : index
    %149 = vector.load %arg15[%c0_71, %c0_72] : memref<8x32xf32, #tpu.memory_space<vmem>>, vector<8x32xf32>
    tpu.vector_store %arg15[%c0_71, %c0_72], %144 {strides = array<i32>} : memref<8x32xf32, #tpu.memory_space<vmem>>, vector<8x32xf32>,
    %c0_73 = arith.constant 0 : index
    %c0_74 = arith.constant 0 : index
    %150 = vector.load %arg16[%c0_73, %c0_74] : memref<8x32xf32, #tpu.memory_space<vmem>>, vector<8x32xf32>
    tpu.vector_store %arg16[%c0_73, %c0_74], %141 {strides = array<i32>} : memref<8x32xf32, #tpu.memory_space<vmem>>, vector<8x32xf32>,
    %151 = arith.index_cast %c1_i32 : i32 to index
    %c0_75 = arith.constant 0 : index
    %c0_76 = arith.constant 0 : index
    %152 = vector.load %arg11[%151, %c0_75, %c0_76] : memref<5x8x32xf32, #tpu.memory_space<vmem>>, vector<1x8x32xf32>
    %153 = vector.shape_cast %152 : vector<1x8x32xf32> to vector<8x32xf32>
    %154 = vector.shape_cast %148 : vector<8x32xf32> to vector<1x8x32xf32>
    tpu.vector_store %arg11[%151, %c0_75, %c0_76], %154 {strides = array<i32>} : memref<5x8x32xf32, #tpu.memory_space<vmem>>, vector<1x8x32xf32>,
    %155 = arith.index_cast %112 : i32 to index
    %c0_77 = arith.constant 0 : index
    %c0_78 = arith.constant 0 : index
    %156 = vector.load %arg14[%155, %c0_77, %c0_78] : memref<5x8x128xf32, #tpu.memory_space<vmem>>, vector<1x8x128xf32>
    %157 = vector.shape_cast %156 : vector<1x8x128xf32> to vector<8x128xf32>
    %c0_79 = arith.constant 0 : index
    %c0_80 = arith.constant 0 : index
    %158 = vector.load %arg17[%c0_79, %c0_80] : memref<8x32xf32, #tpu.memory_space<vmem>>, vector<8x32xf32>
    %c0_81 = arith.constant 0 : index
    %c0_82 = arith.constant 0 : index
    %159 = vector.load %arg18[%c0_81, %c0_82] : memref<8x32xf32, #tpu.memory_space<vmem>>, vector<8x32xf32>
    %160 = vector.broadcast %111 : i32 to vector<8x1xi32>
    %161 = arith.cmpi sgt, %21, %160 : vector<8x1xi32>
    %c0_83 = arith.constant 0 : index
    %c0_84 = arith.constant 0 : index
    %162 = vector.load %arg7[%c0_83, %c0_84] : memref<32x128xf32, #tpu.memory_space<vmem>>, vector<32x128xf32>
    %cst_85 = arith.constant dense<0.000000e+00> : vector<8x128xf32>
    %163 = tpu.matmul %158, %162, %cst_85 {dimension_numbers = #tpu.dot_dimension_numbers<[1], [0], [0], [1], [0, 0, 1, 1], [], []>} : vector<8x32xf32>, vector<32x128xf32>, vector<8x128xf32> -> vector<8x128xf32>
    %164 = arith.addf %157, %163 : vector<8x128xf32>
    %165 = vector.extract_strided_slice %164 {offsets = [0, 0], sizes = [8, 96], strides = [1, 1]} : vector<8x128xf32> to vector<8x96xf32>
    %166 = arith.negf %165 : vector<8x96xf32>
    %167 = math.exp %166 : vector<8x96xf32>
    %cst_86 = arith.constant 1.000000e+00 : f32
    %168 = vector.broadcast %cst_86 : f32 to vector<8x96xf32>
    %169 = arith.addf %168, %167 : vector<8x96xf32>
    %170 = arith.divf %168, %169 : vector<8x96xf32>
    %171 = vector.extract_strided_slice %170 {offsets = [0, 0], sizes = [8, 32], strides = [1, 1]} : vector<8x96xf32> to vector<8x32xf32>
    %172 = vector.extract_strided_slice %170 {offsets = [0, 32], sizes = [8, 32], strides = [1, 1]} : vector<8x96xf32> to vector<8x32xf32>
    %173 = vector.extract_strided_slice %170 {offsets = [0, 64], sizes = [8, 32], strides = [1, 1]} : vector<8x96xf32> to vector<8x32xf32>
    %174 = vector.extract_strided_slice %164 {offsets = [0, 96], sizes = [8, 32], strides = [1, 1]} : vector<8x128xf32> to vector<8x32xf32>
    %175 = math.tanh %174 : vector<8x32xf32>
    %176 = arith.mulf %172, %159 : vector<8x32xf32>
    %177 = arith.mulf %171, %175 : vector<8x32xf32>
    %178 = arith.addf %176, %177 : vector<8x32xf32>
    %179 = math.tanh %178 : vector<8x32xf32>
    %180 = arith.mulf %173, %179 : vector<8x32xf32>
    %181 = vector.shape_cast %161 : vector<8x1xi1> to vector<8x1xi1>
    %182 = vector.broadcast %181 : vector<8x1xi1> to vector<8x32xi1>
    %183 = arith.select %182, %178, %159 : vector<8x32xi1>, vector<8x32xf32>
    %184 = vector.shape_cast %161 : vector<8x1xi1> to vector<8x1xi1>
    %185 = vector.broadcast %184 : vector<8x1xi1> to vector<8x32xi1>
    %186 = arith.select %185, %180, %158 : vector<8x32xi1>, vector<8x32xf32>
    %cst_87 = arith.constant 0.000000e+00 : f32
    %187 = vector.shape_cast %161 : vector<8x1xi1> to vector<8x1xi1>
    %188 = vector.broadcast %187 : vector<8x1xi1> to vector<8x32xi1>
    %189 = vector.broadcast %cst_87 : f32 to vector<8x32xf32>
    %190 = arith.select %188, %180, %189 : vector<8x32xi1>, vector<8x32xf32>
    %c0_88 = arith.constant 0 : index
    %c0_89 = arith.constant 0 : index
    %191 = vector.load %arg17[%c0_88, %c0_89] : memref<8x32xf32, #tpu.memory_space<vmem>>, vector<8x32xf32>
    tpu.vector_store %arg17[%c0_88, %c0_89], %186 {strides = array<i32>} : memref<8x32xf32, #tpu.memory_space<vmem>>, vector<8x32xf32>,
    %c0_90 = arith.constant 0 : index
    %c0_91 = arith.constant 0 : index
    %192 = vector.load %arg18[%c0_90, %c0_91] : memref<8x32xf32, #tpu.memory_space<vmem>>, vector<8x32xf32>
    tpu.vector_store %arg18[%c0_90, %c0_91], %183 {strides = array<i32>} : memref<8x32xf32, #tpu.memory_space<vmem>>, vector<8x32xf32>,
    %193 = arith.index_cast %112 : i32 to index
    %c0_92 = arith.constant 0 : index
    %c0_93 = arith.constant 0 : index
    %194 = vector.load %arg12[%193, %c0_92, %c0_93] : memref<5x8x32xf32, #tpu.memory_space<vmem>>, vector<1x8x32xf32>
    %195 = vector.shape_cast %194 : vector<1x8x32xf32> to vector<8x32xf32>
    %196 = vector.shape_cast %190 : vector<8x32xf32> to vector<1x8x32xf32>
    tpu.vector_store %arg12[%193, %c0_92, %c0_93], %196 {strides = array<i32>} : memref<5x8x32xf32, #tpu.memory_space<vmem>>, vector<1x8x32xf32>,
    %c2_i32 = arith.constant 2 : i32
    %197 = arith.addi %22, %c2_i32 : i32
    %c9_i32_94 = arith.constant 9 : i32
    %198 = arith.subi %c9_i32_94, %197 : i32
    %c4_i32_95 = arith.constant 4 : i32
    %199 = arith.subi %c4_i32_95, %c2_i32 : i32
    %200 = arith.index_cast %c2_i32 : i32 to index
    %c0_96 = arith.constant 0 : index
    %c0_97 = arith.constant 0 : index
    %201 = vector.load %arg13[%200, %c0_96, %c0_97] : memref<5x8x128xf32, #tpu.memory_space<vmem>>, vector<1x8x128xf32>
    %202 = vector.shape_cast %201 : vector<1x8x128xf32> to vector<8x128xf32>
    %c0_98 = arith.constant 0 : index
    %c0_99 = arith.constant 0 : index
    %203 = vector.load %arg15[%c0_98, %c0_99] : memref<8x32xf32, #tpu.memory_space<vmem>>, vector<8x32xf32>
    %c0_100 = arith.constant 0 : index
    %c0_101 = arith.constant 0 : index
    %204 = vector.load %arg16[%c0_100, %c0_101] : memref<8x32xf32, #tpu.memory_space<vmem>>, vector<8x32xf32>
    %205 = vector.broadcast %197 : i32 to vector<8x1xi32>
    %206 = arith.cmpi sgt, %21, %205 : vector<8x1xi32>
    %c0_102 = arith.constant 0 : index
    %c0_103 = arith.constant 0 : index
    %207 = vector.load %arg6[%c0_102, %c0_103] : memref<32x128xf32, #tpu.memory_space<vmem>>, vector<32x128xf32>
    %cst_104 = arith.constant dense<0.000000e+00> : vector<8x128xf32>
    %208 = tpu.matmul %203, %207, %cst_104 {dimension_numbers = #tpu.dot_dimension_numbers<[1], [0], [0], [1], [0, 0, 1, 1], [], []>} : vector<8x32xf32>, vector<32x128xf32>, vector<8x128xf32> -> vector<8x128xf32>
    %209 = arith.addf %202, %208 : vector<8x128xf32>
    %210 = vector.extract_strided_slice %209 {offsets = [0, 0], sizes = [8, 96], strides = [1, 1]} : vector<8x128xf32> to vector<8x96xf32>
    %211 = arith.negf %210 : vector<8x96xf32>
    %212 = math.exp %211 : vector<8x96xf32>
    %cst_105 = arith.constant 1.000000e+00 : f32
    %213 = vector.broadcast %cst_105 : f32 to vector<8x96xf32>
    %214 = arith.addf %213, %212 : vector<8x96xf32>
    %215 = arith.divf %213, %214 : vector<8x96xf32>
    %216 = vector.extract_strided_slice %215 {offsets = [0, 0], sizes = [8, 32], strides = [1, 1]} : vector<8x96xf32> to vector<8x32xf32>
    %217 = vector.extract_strided_slice %215 {offsets = [0, 32], sizes = [8, 32], strides = [1, 1]} : vector<8x96xf32> to vector<8x32xf32>
    %218 = vector.extract_strided_slice %215 {offsets = [0, 64], sizes = [8, 32], strides = [1, 1]} : vector<8x96xf32> to vector<8x32xf32>
    %219 = vector.extract_strided_slice %209 {offsets = [0, 96], sizes = [8, 32], strides = [1, 1]} : vector<8x128xf32> to vector<8x32xf32>
    %220 = math.tanh %219 : vector<8x32xf32>
    %221 = arith.mulf %217, %204 : vector<8x32xf32>
    %222 = arith.mulf %216, %220 : vector<8x32xf32>
    %223 = arith.addf %221, %222 : vector<8x32xf32>
    %224 = math.tanh %223 : vector<8x32xf32>
    %225 = arith.mulf %218, %224 : vector<8x32xf32>
    %226 = vector.shape_cast %206 : vector<8x1xi1> to vector<8x1xi1>
    %227 = vector.broadcast %226 : vector<8x1xi1> to vector<8x32xi1>
    %228 = arith.select %227, %223, %204 : vector<8x32xi1>, vector<8x32xf32>
    %229 = vector.shape_cast %206 : vector<8x1xi1> to vector<8x1xi1>
    %230 = vector.broadcast %229 : vector<8x1xi1> to vector<8x32xi1>
    %231 = arith.select %230, %225, %203 : vector<8x32xi1>, vector<8x32xf32>
    %cst_106 = arith.constant 0.000000e+00 : f32
    %232 = vector.shape_cast %206 : vector<8x1xi1> to vector<8x1xi1>
    %233 = vector.broadcast %232 : vector<8x1xi1> to vector<8x32xi1>
    %234 = vector.broadcast %cst_106 : f32 to vector<8x32xf32>
    %235 = arith.select %233, %225, %234 : vector<8x32xi1>, vector<8x32xf32>
    %c0_107 = arith.constant 0 : index
    %c0_108 = arith.constant 0 : index
    %236 = vector.load %arg15[%c0_107, %c0_108] : memref<8x32xf32, #tpu.memory_space<vmem>>, vector<8x32xf32>
    tpu.vector_store %arg15[%c0_107, %c0_108], %231 {strides = array<i32>} : memref<8x32xf32, #tpu.memory_space<vmem>>, vector<8x32xf32>,
    %c0_109 = arith.constant 0 : index
    %c0_110 = arith.constant 0 : index
    %237 = vector.load %arg16[%c0_109, %c0_110] : memref<8x32xf32, #tpu.memory_space<vmem>>, vector<8x32xf32>
    tpu.vector_store %arg16[%c0_109, %c0_110], %228 {strides = array<i32>} : memref<8x32xf32, #tpu.memory_space<vmem>>, vector<8x32xf32>,
    %238 = arith.index_cast %c2_i32 : i32 to index
    %c0_111 = arith.constant 0 : index
    %c0_112 = arith.constant 0 : index
    %239 = vector.load %arg11[%238, %c0_111, %c0_112] : memref<5x8x32xf32, #tpu.memory_space<vmem>>, vector<1x8x32xf32>
    %240 = vector.shape_cast %239 : vector<1x8x32xf32> to vector<8x32xf32>
    %241 = vector.shape_cast %235 : vector<8x32xf32> to vector<1x8x32xf32>
    tpu.vector_store %arg11[%238, %c0_111, %c0_112], %241 {strides = array<i32>} : memref<5x8x32xf32, #tpu.memory_space<vmem>>, vector<1x8x32xf32>,
    %242 = arith.index_cast %199 : i32 to index
    %c0_113 = arith.constant 0 : index
    %c0_114 = arith.constant 0 : index
    %243 = vector.load %arg14[%242, %c0_113, %c0_114] : memref<5x8x128xf32, #tpu.memory_space<vmem>>, vector<1x8x128xf32>
    %244 = vector.shape_cast %243 : vector<1x8x128xf32> to vector<8x128xf32>
    %c0_115 = arith.constant 0 : index
    %c0_116 = arith.constant 0 : index
    %245 = vector.load %arg17[%c0_115, %c0_116] : memref<8x32xf32, #tpu.memory_space<vmem>>, vector<8x32xf32>
    %c0_117 = arith.constant 0 : index
    %c0_118 = arith.constant 0 : index
    %246 = vector.load %arg18[%c0_117, %c0_118] : memref<8x32xf32, #tpu.memory_space<vmem>>, vector<8x32xf32>
    %247 = vector.broadcast %198 : i32 to vector<8x1xi32>
    %248 = arith.cmpi sgt, %21, %247 : vector<8x1xi32>
    %c0_119 = arith.constant 0 : index
    %c0_120 = arith.constant 0 : index
    %249 = vector.load %arg7[%c0_119, %c0_120] : memref<32x128xf32, #tpu.memory_space<vmem>>, vector<32x128xf32>
    %cst_121 = arith.constant dense<0.000000e+00> : vector<8x128xf32>
    %250 = tpu.matmul %245, %249, %cst_121 {dimension_numbers = #tpu.dot_dimension_numbers<[1], [0], [0], [1], [0, 0, 1, 1], [], []>} : vector<8x32xf32>, vector<32x128xf32>, vector<8x128xf32> -> vector<8x128xf32>
    %251 = arith.addf %244, %250 : vector<8x128xf32>
    %252 = vector.extract_strided_slice %251 {offsets = [0, 0], sizes = [8, 96], strides = [1, 1]} : vector<8x128xf32> to vector<8x96xf32>
    %253 = arith.negf %252 : vector<8x96xf32>
    %254 = math.exp %253 : vector<8x96xf32>
    %cst_122 = arith.constant 1.000000e+00 : f32
    %255 = vector.broadcast %cst_122 : f32 to vector<8x96xf32>
    %256 = arith.addf %255, %254 : vector<8x96xf32>
    %257 = arith.divf %255, %256 : vector<8x96xf32>
    %258 = vector.extract_strided_slice %257 {offsets = [0, 0], sizes = [8, 32], strides = [1, 1]} : vector<8x96xf32> to vector<8x32xf32>
    %259 = vector.extract_strided_slice %257 {offsets = [0, 32], sizes = [8, 32], strides = [1, 1]} : vector<8x96xf32> to vector<8x32xf32>
    %260 = vector.extract_strided_slice %257 {offsets = [0, 64], sizes = [8, 32], strides = [1, 1]} : vector<8x96xf32> to vector<8x32xf32>
    %261 = vector.extract_strided_slice %251 {offsets = [0, 96], sizes = [8, 32], strides = [1, 1]} : vector<8x128xf32> to vector<8x32xf32>
    %262 = math.tanh %261 : vector<8x32xf32>
    %263 = arith.mulf %259, %246 : vector<8x32xf32>
    %264 = arith.mulf %258, %262 : vector<8x32xf32>
    %265 = arith.addf %263, %264 : vector<8x32xf32>
    %266 = math.tanh %265 : vector<8x32xf32>
    %267 = arith.mulf %260, %266 : vector<8x32xf32>
    %268 = vector.shape_cast %248 : vector<8x1xi1> to vector<8x1xi1>
    %269 = vector.broadcast %268 : vector<8x1xi1> to vector<8x32xi1>
    %270 = arith.select %269, %265, %246 : vector<8x32xi1>, vector<8x32xf32>
    %271 = vector.shape_cast %248 : vector<8x1xi1> to vector<8x1xi1>
    %272 = vector.broadcast %271 : vector<8x1xi1> to vector<8x32xi1>
    %273 = arith.select %272, %267, %245 : vector<8x32xi1>, vector<8x32xf32>
    %cst_123 = arith.constant 0.000000e+00 : f32
    %274 = vector.shape_cast %248 : vector<8x1xi1> to vector<8x1xi1>
    %275 = vector.broadcast %274 : vector<8x1xi1> to vector<8x32xi1>
    %276 = vector.broadcast %cst_123 : f32 to vector<8x32xf32>
    %277 = arith.select %275, %267, %276 : vector<8x32xi1>, vector<8x32xf32>
    %c0_124 = arith.constant 0 : index
    %c0_125 = arith.constant 0 : index
    %278 = vector.load %arg17[%c0_124, %c0_125] : memref<8x32xf32, #tpu.memory_space<vmem>>, vector<8x32xf32>
    tpu.vector_store %arg17[%c0_124, %c0_125], %273 {strides = array<i32>} : memref<8x32xf32, #tpu.memory_space<vmem>>, vector<8x32xf32>,
    %c0_126 = arith.constant 0 : index
    %c0_127 = arith.constant 0 : index
    %279 = vector.load %arg18[%c0_126, %c0_127] : memref<8x32xf32, #tpu.memory_space<vmem>>, vector<8x32xf32>
    tpu.vector_store %arg18[%c0_126, %c0_127], %270 {strides = array<i32>} : memref<8x32xf32, #tpu.memory_space<vmem>>, vector<8x32xf32>,
    %280 = arith.index_cast %199 : i32 to index
    %c0_128 = arith.constant 0 : index
    %c0_129 = arith.constant 0 : index
    %281 = vector.load %arg12[%280, %c0_128, %c0_129] : memref<5x8x32xf32, #tpu.memory_space<vmem>>, vector<1x8x32xf32>
    %282 = vector.shape_cast %281 : vector<1x8x32xf32> to vector<8x32xf32>
    %283 = vector.shape_cast %277 : vector<8x32xf32> to vector<1x8x32xf32>
    tpu.vector_store %arg12[%280, %c0_128, %c0_129], %283 {strides = array<i32>} : memref<5x8x32xf32, #tpu.memory_space<vmem>>, vector<1x8x32xf32>,
    %c3_i32 = arith.constant 3 : i32
    %284 = arith.addi %22, %c3_i32 : i32
    %c9_i32_130 = arith.constant 9 : i32
    %285 = arith.subi %c9_i32_130, %284 : i32
    %c4_i32_131 = arith.constant 4 : i32
    %286 = arith.subi %c4_i32_131, %c3_i32 : i32
    %287 = arith.index_cast %c3_i32 : i32 to index
    %c0_132 = arith.constant 0 : index
    %c0_133 = arith.constant 0 : index
    %288 = vector.load %arg13[%287, %c0_132, %c0_133] : memref<5x8x128xf32, #tpu.memory_space<vmem>>, vector<1x8x128xf32>
    %289 = vector.shape_cast %288 : vector<1x8x128xf32> to vector<8x128xf32>
    %c0_134 = arith.constant 0 : index
    %c0_135 = arith.constant 0 : index
    %290 = vector.load %arg15[%c0_134, %c0_135] : memref<8x32xf32, #tpu.memory_space<vmem>>, vector<8x32xf32>
    %c0_136 = arith.constant 0 : index
    %c0_137 = arith.constant 0 : index
    %291 = vector.load %arg16[%c0_136, %c0_137] : memref<8x32xf32, #tpu.memory_space<vmem>>, vector<8x32xf32>
    %292 = vector.broadcast %284 : i32 to vector<8x1xi32>
    %293 = arith.cmpi sgt, %21, %292 : vector<8x1xi32>
    %c0_138 = arith.constant 0 : index
    %c0_139 = arith.constant 0 : index
    %294 = vector.load %arg6[%c0_138, %c0_139] : memref<32x128xf32, #tpu.memory_space<vmem>>, vector<32x128xf32>
    %cst_140 = arith.constant dense<0.000000e+00> : vector<8x128xf32>
    %295 = tpu.matmul %290, %294, %cst_140 {dimension_numbers = #tpu.dot_dimension_numbers<[1], [0], [0], [1], [0, 0, 1, 1], [], []>} : vector<8x32xf32>, vector<32x128xf32>, vector<8x128xf32> -> vector<8x128xf32>
    %296 = arith.addf %289, %295 : vector<8x128xf32>
    %297 = vector.extract_strided_slice %296 {offsets = [0, 0], sizes = [8, 96], strides = [1, 1]} : vector<8x128xf32> to vector<8x96xf32>
    %298 = arith.negf %297 : vector<8x96xf32>
    %299 = math.exp %298 : vector<8x96xf32>
    %cst_141 = arith.constant 1.000000e+00 : f32
    %300 = vector.broadcast %cst_141 : f32 to vector<8x96xf32>
    %301 = arith.addf %300, %299 : vector<8x96xf32>
    %302 = arith.divf %300, %301 : vector<8x96xf32>
    %303 = vector.extract_strided_slice %302 {offsets = [0, 0], sizes = [8, 32], strides = [1, 1]} : vector<8x96xf32> to vector<8x32xf32>
    %304 = vector.extract_strided_slice %302 {offsets = [0, 32], sizes = [8, 32], strides = [1, 1]} : vector<8x96xf32> to vector<8x32xf32>
    %305 = vector.extract_strided_slice %302 {offsets = [0, 64], sizes = [8, 32], strides = [1, 1]} : vector<8x96xf32> to vector<8x32xf32>
    %306 = vector.extract_strided_slice %296 {offsets = [0, 96], sizes = [8, 32], strides = [1, 1]} : vector<8x128xf32> to vector<8x32xf32>
    %307 = math.tanh %306 : vector<8x32xf32>
    %308 = arith.mulf %304, %291 : vector<8x32xf32>
    %309 = arith.mulf %303, %307 : vector<8x32xf32>
    %310 = arith.addf %308, %309 : vector<8x32xf32>
    %311 = math.tanh %310 : vector<8x32xf32>
    %312 = arith.mulf %305, %311 : vector<8x32xf32>
    %313 = vector.shape_cast %293 : vector<8x1xi1> to vector<8x1xi1>
    %314 = vector.broadcast %313 : vector<8x1xi1> to vector<8x32xi1>
    %315 = arith.select %314, %310, %291 : vector<8x32xi1>, vector<8x32xf32>
    %316 = vector.shape_cast %293 : vector<8x1xi1> to vector<8x1xi1>
    %317 = vector.broadcast %316 : vector<8x1xi1> to vector<8x32xi1>
    %318 = arith.select %317, %312, %290 : vector<8x32xi1>, vector<8x32xf32>
    %cst_142 = arith.constant 0.000000e+00 : f32
    %319 = vector.shape_cast %293 : vector<8x1xi1> to vector<8x1xi1>
    %320 = vector.broadcast %319 : vector<8x1xi1> to vector<8x32xi1>
    %321 = vector.broadcast %cst_142 : f32 to vector<8x32xf32>
    %322 = arith.select %320, %312, %321 : vector<8x32xi1>, vector<8x32xf32>
    %c0_143 = arith.constant 0 : index
    %c0_144 = arith.constant 0 : index
    %323 = vector.load %arg15[%c0_143, %c0_144] : memref<8x32xf32, #tpu.memory_space<vmem>>, vector<8x32xf32>
    tpu.vector_store %arg15[%c0_143, %c0_144], %318 {strides = array<i32>} : memref<8x32xf32, #tpu.memory_space<vmem>>, vector<8x32xf32>,
    %c0_145 = arith.constant 0 : index
    %c0_146 = arith.constant 0 : index
    %324 = vector.load %arg16[%c0_145, %c0_146] : memref<8x32xf32, #tpu.memory_space<vmem>>, vector<8x32xf32>
    tpu.vector_store %arg16[%c0_145, %c0_146], %315 {strides = array<i32>} : memref<8x32xf32, #tpu.memory_space<vmem>>, vector<8x32xf32>,
    %325 = arith.index_cast %c3_i32 : i32 to index
    %c0_147 = arith.constant 0 : index
    %c0_148 = arith.constant 0 : index
    %326 = vector.load %arg11[%325, %c0_147, %c0_148] : memref<5x8x32xf32, #tpu.memory_space<vmem>>, vector<1x8x32xf32>
    %327 = vector.shape_cast %326 : vector<1x8x32xf32> to vector<8x32xf32>
    %328 = vector.shape_cast %322 : vector<8x32xf32> to vector<1x8x32xf32>
    tpu.vector_store %arg11[%325, %c0_147, %c0_148], %328 {strides = array<i32>} : memref<5x8x32xf32, #tpu.memory_space<vmem>>, vector<1x8x32xf32>,
    %329 = arith.index_cast %286 : i32 to index
    %c0_149 = arith.constant 0 : index
    %c0_150 = arith.constant 0 : index
    %330 = vector.load %arg14[%329, %c0_149, %c0_150] : memref<5x8x128xf32, #tpu.memory_space<vmem>>, vector<1x8x128xf32>
    %331 = vector.shape_cast %330 : vector<1x8x128xf32> to vector<8x128xf32>
    %c0_151 = arith.constant 0 : index
    %c0_152 = arith.constant 0 : index
    %332 = vector.load %arg17[%c0_151, %c0_152] : memref<8x32xf32, #tpu.memory_space<vmem>>, vector<8x32xf32>
    %c0_153 = arith.constant 0 : index
    %c0_154 = arith.constant 0 : index
    %333 = vector.load %arg18[%c0_153, %c0_154] : memref<8x32xf32, #tpu.memory_space<vmem>>, vector<8x32xf32>
    %334 = vector.broadcast %285 : i32 to vector<8x1xi32>
    %335 = arith.cmpi sgt, %21, %334 : vector<8x1xi32>
    %c0_155 = arith.constant 0 : index
    %c0_156 = arith.constant 0 : index
    %336 = vector.load %arg7[%c0_155, %c0_156] : memref<32x128xf32, #tpu.memory_space<vmem>>, vector<32x128xf32>
    %cst_157 = arith.constant dense<0.000000e+00> : vector<8x128xf32>
    %337 = tpu.matmul %332, %336, %cst_157 {dimension_numbers = #tpu.dot_dimension_numbers<[1], [0], [0], [1], [0, 0, 1, 1], [], []>} : vector<8x32xf32>, vector<32x128xf32>, vector<8x128xf32> -> vector<8x128xf32>
    %338 = arith.addf %331, %337 : vector<8x128xf32>
    %339 = vector.extract_strided_slice %338 {offsets = [0, 0], sizes = [8, 96], strides = [1, 1]} : vector<8x128xf32> to vector<8x96xf32>
    %340 = arith.negf %339 : vector<8x96xf32>
    %341 = math.exp %340 : vector<8x96xf32>
    %cst_158 = arith.constant 1.000000e+00 : f32
    %342 = vector.broadcast %cst_158 : f32 to vector<8x96xf32>
    %343 = arith.addf %342, %341 : vector<8x96xf32>
    %344 = arith.divf %342, %343 : vector<8x96xf32>
    %345 = vector.extract_strided_slice %344 {offsets = [0, 0], sizes = [8, 32], strides = [1, 1]} : vector<8x96xf32> to vector<8x32xf32>
    %346 = vector.extract_strided_slice %344 {offsets = [0, 32], sizes = [8, 32], strides = [1, 1]} : vector<8x96xf32> to vector<8x32xf32>
    %347 = vector.extract_strided_slice %344 {offsets = [0, 64], sizes = [8, 32], strides = [1, 1]} : vector<8x96xf32> to vector<8x32xf32>
    %348 = vector.extract_strided_slice %338 {offsets = [0, 96], sizes = [8, 32], strides = [1, 1]} : vector<8x128xf32> to vector<8x32xf32>
    %349 = math.tanh %348 : vector<8x32xf32>
    %350 = arith.mulf %346, %333 : vector<8x32xf32>
    %351 = arith.mulf %345, %349 : vector<8x32xf32>
    %352 = arith.addf %350, %351 : vector<8x32xf32>
    %353 = math.tanh %352 : vector<8x32xf32>
    %354 = arith.mulf %347, %353 : vector<8x32xf32>
    %355 = vector.shape_cast %335 : vector<8x1xi1> to vector<8x1xi1>
    %356 = vector.broadcast %355 : vector<8x1xi1> to vector<8x32xi1>
    %357 = arith.select %356, %352, %333 : vector<8x32xi1>, vector<8x32xf32>
    %358 = vector.shape_cast %335 : vector<8x1xi1> to vector<8x1xi1>
    %359 = vector.broadcast %358 : vector<8x1xi1> to vector<8x32xi1>
    %360 = arith.select %359, %354, %332 : vector<8x32xi1>, vector<8x32xf32>
    %cst_159 = arith.constant 0.000000e+00 : f32
    %361 = vector.shape_cast %335 : vector<8x1xi1> to vector<8x1xi1>
    %362 = vector.broadcast %361 : vector<8x1xi1> to vector<8x32xi1>
    %363 = vector.broadcast %cst_159 : f32 to vector<8x32xf32>
    %364 = arith.select %362, %354, %363 : vector<8x32xi1>, vector<8x32xf32>
    %c0_160 = arith.constant 0 : index
    %c0_161 = arith.constant 0 : index
    %365 = vector.load %arg17[%c0_160, %c0_161] : memref<8x32xf32, #tpu.memory_space<vmem>>, vector<8x32xf32>
    tpu.vector_store %arg17[%c0_160, %c0_161], %360 {strides = array<i32>} : memref<8x32xf32, #tpu.memory_space<vmem>>, vector<8x32xf32>,
    %c0_162 = arith.constant 0 : index
    %c0_163 = arith.constant 0 : index
    %366 = vector.load %arg18[%c0_162, %c0_163] : memref<8x32xf32, #tpu.memory_space<vmem>>, vector<8x32xf32>
    tpu.vector_store %arg18[%c0_162, %c0_163], %357 {strides = array<i32>} : memref<8x32xf32, #tpu.memory_space<vmem>>, vector<8x32xf32>,
    %367 = arith.index_cast %286 : i32 to index
    %c0_164 = arith.constant 0 : index
    %c0_165 = arith.constant 0 : index
    %368 = vector.load %arg12[%367, %c0_164, %c0_165] : memref<5x8x32xf32, #tpu.memory_space<vmem>>, vector<1x8x32xf32>
    %369 = vector.shape_cast %368 : vector<1x8x32xf32> to vector<8x32xf32>
    %370 = vector.shape_cast %364 : vector<8x32xf32> to vector<1x8x32xf32>
    tpu.vector_store %arg12[%367, %c0_164, %c0_165], %370 {strides = array<i32>} : memref<5x8x32xf32, #tpu.memory_space<vmem>>, vector<1x8x32xf32>,
    %c4_i32_166 = arith.constant 4 : i32
    %371 = arith.addi %22, %c4_i32_166 : i32
    %c9_i32_167 = arith.constant 9 : i32
    %372 = arith.subi %c9_i32_167, %371 : i32
    %c4_i32_168 = arith.constant 4 : i32
    %373 = arith.subi %c4_i32_168, %c4_i32_166 : i32
    %374 = arith.index_cast %c4_i32_166 : i32 to index
    %c0_169 = arith.constant 0 : index
    %c0_170 = arith.constant 0 : index
    %375 = vector.load %arg13[%374, %c0_169, %c0_170] : memref<5x8x128xf32, #tpu.memory_space<vmem>>, vector<1x8x128xf32>
    %376 = vector.shape_cast %375 : vector<1x8x128xf32> to vector<8x128xf32>
    %c0_171 = arith.constant 0 : index
    %c0_172 = arith.constant 0 : index
    %377 = vector.load %arg15[%c0_171, %c0_172] : memref<8x32xf32, #tpu.memory_space<vmem>>, vector<8x32xf32>
    %c0_173 = arith.constant 0 : index
    %c0_174 = arith.constant 0 : index
    %378 = vector.load %arg16[%c0_173, %c0_174] : memref<8x32xf32, #tpu.memory_space<vmem>>, vector<8x32xf32>
    %379 = vector.broadcast %371 : i32 to vector<8x1xi32>
    %380 = arith.cmpi sgt, %21, %379 : vector<8x1xi32>
    %c0_175 = arith.constant 0 : index
    %c0_176 = arith.constant 0 : index
    %381 = vector.load %arg6[%c0_175, %c0_176] : memref<32x128xf32, #tpu.memory_space<vmem>>, vector<32x128xf32>
    %cst_177 = arith.constant dense<0.000000e+00> : vector<8x128xf32>
    %382 = tpu.matmul %377, %381, %cst_177 {dimension_numbers = #tpu.dot_dimension_numbers<[1], [0], [0], [1], [0, 0, 1, 1], [], []>} : vector<8x32xf32>, vector<32x128xf32>, vector<8x128xf32> -> vector<8x128xf32>
    %383 = arith.addf %376, %382 : vector<8x128xf32>
    %384 = vector.extract_strided_slice %383 {offsets = [0, 0], sizes = [8, 96], strides = [1, 1]} : vector<8x128xf32> to vector<8x96xf32>
    %385 = arith.negf %384 : vector<8x96xf32>
    %386 = math.exp %385 : vector<8x96xf32>
    %cst_178 = arith.constant 1.000000e+00 : f32
    %387 = vector.broadcast %cst_178 : f32 to vector<8x96xf32>
    %388 = arith.addf %387, %386 : vector<8x96xf32>
    %389 = arith.divf %387, %388 : vector<8x96xf32>
    %390 = vector.extract_strided_slice %389 {offsets = [0, 0], sizes = [8, 32], strides = [1, 1]} : vector<8x96xf32> to vector<8x32xf32>
    %391 = vector.extract_strided_slice %389 {offsets = [0, 32], sizes = [8, 32], strides = [1, 1]} : vector<8x96xf32> to vector<8x32xf32>
    %392 = vector.extract_strided_slice %389 {offsets = [0, 64], sizes = [8, 32], strides = [1, 1]} : vector<8x96xf32> to vector<8x32xf32>
    %393 = vector.extract_strided_slice %383 {offsets = [0, 96], sizes = [8, 32], strides = [1, 1]} : vector<8x128xf32> to vector<8x32xf32>
    %394 = math.tanh %393 : vector<8x32xf32>
    %395 = arith.mulf %391, %378 : vector<8x32xf32>
    %396 = arith.mulf %390, %394 : vector<8x32xf32>
    %397 = arith.addf %395, %396 : vector<8x32xf32>
    %398 = math.tanh %397 : vector<8x32xf32>
    %399 = arith.mulf %392, %398 : vector<8x32xf32>
    %400 = vector.shape_cast %380 : vector<8x1xi1> to vector<8x1xi1>
    %401 = vector.broadcast %400 : vector<8x1xi1> to vector<8x32xi1>
    %402 = arith.select %401, %397, %378 : vector<8x32xi1>, vector<8x32xf32>
    %403 = vector.shape_cast %380 : vector<8x1xi1> to vector<8x1xi1>
    %404 = vector.broadcast %403 : vector<8x1xi1> to vector<8x32xi1>
    %405 = arith.select %404, %399, %377 : vector<8x32xi1>, vector<8x32xf32>
    %cst_179 = arith.constant 0.000000e+00 : f32
    %406 = vector.shape_cast %380 : vector<8x1xi1> to vector<8x1xi1>
    %407 = vector.broadcast %406 : vector<8x1xi1> to vector<8x32xi1>
    %408 = vector.broadcast %cst_179 : f32 to vector<8x32xf32>
    %409 = arith.select %407, %399, %408 : vector<8x32xi1>, vector<8x32xf32>
    %c0_180 = arith.constant 0 : index
    %c0_181 = arith.constant 0 : index
    %410 = vector.load %arg15[%c0_180, %c0_181] : memref<8x32xf32, #tpu.memory_space<vmem>>, vector<8x32xf32>
    tpu.vector_store %arg15[%c0_180, %c0_181], %405 {strides = array<i32>} : memref<8x32xf32, #tpu.memory_space<vmem>>, vector<8x32xf32>,
    %c0_182 = arith.constant 0 : index
    %c0_183 = arith.constant 0 : index
    %411 = vector.load %arg16[%c0_182, %c0_183] : memref<8x32xf32, #tpu.memory_space<vmem>>, vector<8x32xf32>
    tpu.vector_store %arg16[%c0_182, %c0_183], %402 {strides = array<i32>} : memref<8x32xf32, #tpu.memory_space<vmem>>, vector<8x32xf32>,
    %412 = arith.index_cast %c4_i32_166 : i32 to index
    %c0_184 = arith.constant 0 : index
    %c0_185 = arith.constant 0 : index
    %413 = vector.load %arg11[%412, %c0_184, %c0_185] : memref<5x8x32xf32, #tpu.memory_space<vmem>>, vector<1x8x32xf32>
    %414 = vector.shape_cast %413 : vector<1x8x32xf32> to vector<8x32xf32>
    %415 = vector.shape_cast %409 : vector<8x32xf32> to vector<1x8x32xf32>
    tpu.vector_store %arg11[%412, %c0_184, %c0_185], %415 {strides = array<i32>} : memref<5x8x32xf32, #tpu.memory_space<vmem>>, vector<1x8x32xf32>,
    %416 = arith.index_cast %373 : i32 to index
    %c0_186 = arith.constant 0 : index
    %c0_187 = arith.constant 0 : index
    %417 = vector.load %arg14[%416, %c0_186, %c0_187] : memref<5x8x128xf32, #tpu.memory_space<vmem>>, vector<1x8x128xf32>
    %418 = vector.shape_cast %417 : vector<1x8x128xf32> to vector<8x128xf32>
    %c0_188 = arith.constant 0 : index
    %c0_189 = arith.constant 0 : index
    %419 = vector.load %arg17[%c0_188, %c0_189] : memref<8x32xf32, #tpu.memory_space<vmem>>, vector<8x32xf32>
    %c0_190 = arith.constant 0 : index
    %c0_191 = arith.constant 0 : index
    %420 = vector.load %arg18[%c0_190, %c0_191] : memref<8x32xf32, #tpu.memory_space<vmem>>, vector<8x32xf32>
    %421 = vector.broadcast %372 : i32 to vector<8x1xi32>
    %422 = arith.cmpi sgt, %21, %421 : vector<8x1xi32>
    %c0_192 = arith.constant 0 : index
    %c0_193 = arith.constant 0 : index
    %423 = vector.load %arg7[%c0_192, %c0_193] : memref<32x128xf32, #tpu.memory_space<vmem>>, vector<32x128xf32>
    %cst_194 = arith.constant dense<0.000000e+00> : vector<8x128xf32>
    %424 = tpu.matmul %419, %423, %cst_194 {dimension_numbers = #tpu.dot_dimension_numbers<[1], [0], [0], [1], [0, 0, 1, 1], [], []>} : vector<8x32xf32>, vector<32x128xf32>, vector<8x128xf32> -> vector<8x128xf32>
    %425 = arith.addf %418, %424 : vector<8x128xf32>
    %426 = vector.extract_strided_slice %425 {offsets = [0, 0], sizes = [8, 96], strides = [1, 1]} : vector<8x128xf32> to vector<8x96xf32>
    %427 = arith.negf %426 : vector<8x96xf32>
    %428 = math.exp %427 : vector<8x96xf32>
    %cst_195 = arith.constant 1.000000e+00 : f32
    %429 = vector.broadcast %cst_195 : f32 to vector<8x96xf32>
    %430 = arith.addf %429, %428 : vector<8x96xf32>
    %431 = arith.divf %429, %430 : vector<8x96xf32>
    %432 = vector.extract_strided_slice %431 {offsets = [0, 0], sizes = [8, 32], strides = [1, 1]} : vector<8x96xf32> to vector<8x32xf32>
    %433 = vector.extract_strided_slice %431 {offsets = [0, 32], sizes = [8, 32], strides = [1, 1]} : vector<8x96xf32> to vector<8x32xf32>
    %434 = vector.extract_strided_slice %431 {offsets = [0, 64], sizes = [8, 32], strides = [1, 1]} : vector<8x96xf32> to vector<8x32xf32>
    %435 = vector.extract_strided_slice %425 {offsets = [0, 96], sizes = [8, 32], strides = [1, 1]} : vector<8x128xf32> to vector<8x32xf32>
    %436 = math.tanh %435 : vector<8x32xf32>
    %437 = arith.mulf %433, %420 : vector<8x32xf32>
    %438 = arith.mulf %432, %436 : vector<8x32xf32>
    %439 = arith.addf %437, %438 : vector<8x32xf32>
    %440 = math.tanh %439 : vector<8x32xf32>
    %441 = arith.mulf %434, %440 : vector<8x32xf32>
    %442 = vector.shape_cast %422 : vector<8x1xi1> to vector<8x1xi1>
    %443 = vector.broadcast %442 : vector<8x1xi1> to vector<8x32xi1>
    %444 = arith.select %443, %439, %420 : vector<8x32xi1>, vector<8x32xf32>
    %445 = vector.shape_cast %422 : vector<8x1xi1> to vector<8x1xi1>
    %446 = vector.broadcast %445 : vector<8x1xi1> to vector<8x32xi1>
    %447 = arith.select %446, %441, %419 : vector<8x32xi1>, vector<8x32xf32>
    %cst_196 = arith.constant 0.000000e+00 : f32
    %448 = vector.shape_cast %422 : vector<8x1xi1> to vector<8x1xi1>
    %449 = vector.broadcast %448 : vector<8x1xi1> to vector<8x32xi1>
    %450 = vector.broadcast %cst_196 : f32 to vector<8x32xf32>
    %451 = arith.select %449, %441, %450 : vector<8x32xi1>, vector<8x32xf32>
    %c0_197 = arith.constant 0 : index
    %c0_198 = arith.constant 0 : index
    %452 = vector.load %arg17[%c0_197, %c0_198] : memref<8x32xf32, #tpu.memory_space<vmem>>, vector<8x32xf32>
    tpu.vector_store %arg17[%c0_197, %c0_198], %447 {strides = array<i32>} : memref<8x32xf32, #tpu.memory_space<vmem>>, vector<8x32xf32>,
    %c0_199 = arith.constant 0 : index
    %c0_200 = arith.constant 0 : index
    %453 = vector.load %arg18[%c0_199, %c0_200] : memref<8x32xf32, #tpu.memory_space<vmem>>, vector<8x32xf32>
    tpu.vector_store %arg18[%c0_199, %c0_200], %444 {strides = array<i32>} : memref<8x32xf32, #tpu.memory_space<vmem>>, vector<8x32xf32>,
    %454 = arith.index_cast %373 : i32 to index
    %c0_201 = arith.constant 0 : index
    %c0_202 = arith.constant 0 : index
    %455 = vector.load %arg12[%454, %c0_201, %c0_202] : memref<5x8x32xf32, #tpu.memory_space<vmem>>, vector<1x8x32xf32>
    %456 = vector.shape_cast %455 : vector<1x8x32xf32> to vector<8x32xf32>
    %457 = vector.shape_cast %451 : vector<8x32xf32> to vector<1x8x32xf32>
    tpu.vector_store %arg12[%454, %c0_201, %c0_202], %457 {strides = array<i32>} : memref<5x8x32xf32, #tpu.memory_space<vmem>>, vector<1x8x32xf32>,
    %c5_i32_203 = arith.constant 5 : i32
    return
  }
  func.func @transform_0(%arg0: i32, %arg1: i32) -> (i32, i32, i32) {
    %c0_i32 = arith.constant 0 : i32
    %c0_i32_0 = arith.constant 0 : i32
    return %arg1, %arg0, %c0_i32 : i32, i32, i32
  }
  func.func @transform_1(%arg0: i32, %arg1: i32) -> (i32, i32, i32) {
    %c1_i32 = arith.constant 1 : i32
    %0 = arith.subi %c1_i32, %arg1 : i32
    %c0_i32 = arith.constant 0 : i32
    %c0_i32_0 = arith.constant 0 : i32
    return %0, %arg0, %c0_i32 : i32, i32, i32
  }
  func.func @transform_2(%arg0: i32, %arg1: i32) -> (i32, i32) {
    %c0_i32 = arith.constant 0 : i32
    %c0_i32_0 = arith.constant 0 : i32
    %c0_i32_1 = arith.constant 0 : i32
    return %c0_i32, %c0_i32_0 : i32, i32
  }
  func.func @transform_3(%arg0: i32, %arg1: i32) -> (i32, i32) {
    %c0_i32 = arith.constant 0 : i32
    %c0_i32_0 = arith.constant 0 : i32
    %c0_i32_1 = arith.constant 0 : i32
    return %c0_i32, %c0_i32_0 : i32, i32
  }
  func.func @transform_4(%arg0: i32, %arg1: i32) -> (i32, i32) {
    %c0_i32 = arith.constant 0 : i32
    %c0_i32_0 = arith.constant 0 : i32
    %c0_i32_1 = arith.constant 0 : i32
    return %c0_i32, %c0_i32_0 : i32, i32
  }
  func.func @transform_5(%arg0: i32, %arg1: i32) -> (i32, i32) {
    %c0_i32 = arith.constant 0 : i32
    %c0_i32_0 = arith.constant 0 : i32
    %c0_i32_1 = arith.constant 0 : i32
    return %c0_i32, %c0_i32_0 : i32, i32
  }
  func.func @transform_6(%arg0: i32, %arg1: i32) -> (i32, i32) {
    %c0_i32 = arith.constant 0 : i32
    %c0_i32_0 = arith.constant 0 : i32
    %c0_i32_1 = arith.constant 0 : i32
    return %c0_i32, %c0_i32_0 : i32, i32
  }
  func.func @transform_7(%arg0: i32, %arg1: i32) -> (i32, i32) {
    %c0_i32 = arith.constant 0 : i32
    %c0_i32_0 = arith.constant 0 : i32
    %c0_i32_1 = arith.constant 0 : i32
    return %c0_i32, %c0_i32_0 : i32, i32
  }
  func.func @transform_8(%arg0: i32, %arg1: i32) -> (i32, i32) {
    %c0_i32 = arith.constant 0 : i32
    %c0_i32_0 = arith.constant 0 : i32
    return %arg0, %c0_i32 : i32, i32
  }
  func.func @transform_9(%arg0: i32, %arg1: i32) -> (i32, i32, i32) {
    %c0_i32 = arith.constant 0 : i32
    %c0_i32_0 = arith.constant 0 : i32
    return %arg1, %arg0, %c0_i32 : i32, i32, i32
  }
  func.func @transform_10(%arg0: i32, %arg1: i32) -> (i32, i32, i32) {
    %c1_i32 = arith.constant 1 : i32
    %0 = arith.subi %c1_i32, %arg1 : i32
    %c0_i32 = arith.constant 0 : i32
    %c0_i32_0 = arith.constant 0 : i32
    return %0, %arg0, %c0_i32 : i32, i32, i32
  }
}

</mosaic_0001>

<bundles_post_ra>
// kernel: tpu_custom_call.1
= control target key start
LH: loop header
LB: loop body
LE: loop exit
PB: predicated region body
PF: predicated region fallthrough
CT: control target
= control target key end

     0   :  { %s3329_s0 = inlined_call_operand.hbm [shape: f32[10,8,16], index: 0, kind: input, shape index: {}]   ;;  %s3330_s1 = inlined_call_operand.hbm [shape: f32[10,8,16], index: 1, kind: input, shape index: {}]   ;;  %s3331_s2 = inlined_call_operand.hbm [shape: f32[16,128], index: 2, kind: input, shape index: {}]   ;;  %s3332_s3 = inlined_call_operand.hbm [shape: f32[16,128], index: 3, kind: input, shape index: {}]   ;;  %s3333_s4 = inlined_call_operand.hbm [shape: f32[32,128], index: 4, kind: input, shape index: {}]   ;;  %s3334_s5 = inlined_call_operand.hbm [shape: f32[32,128], index: 5, kind: input, shape index: {}]   ;;  %s3335_s6 = inlined_call_operand.vmem [shape: f32[1,128], index: 6, kind: input, shape index: {}]   ;;  %s3336_s7 = inlined_call_operand.vmem [shape: f32[1,128], index: 7, kind: input, shape index: {}]   ;;  %s3337_s8 = inlined_call_operand.vmem [shape: s32[8,1], index: 8, kind: input, shape index: {}]   ;;  %s3338_s9 = inlined_call_operand.hbm [shape: f32[10,8,32], index: 9, kind: output, shape index: {0}]   ;;  %s3339_s10 = inlined_call_operand.hbm [shape: f32[10,8,32], index: 10, kind: output, shape index: {1}]  }
   0x1   :  { %3356 = sst [smem:[#allocation36_spill]] %s3329_s0 }
   0x2   :  { %3357 = sst [smem:[#allocation37_spill]] %s3330_s1 }
   0x3   :  { %3358 = sst [smem:[#allocation38_spill]] %s3331_s2 }
   0x4   :  { %3359 = sst [smem:[#allocation39_spill]] %s3332_s3 }
   0x5   :  { %3360 = sst [smem:[#allocation40_spill]] %s3333_s4 }
   0x6   :  { %3361 = sst [smem:[#allocation41_spill]] %s3334_s5 }
   0x7   :  { %3362 = sst [smem:[#allocation42_spill]] %s3335_s6 }
   0x8   :  { %3363 = sst [smem:[#allocation43_spill]] %s3337_s8 }
   0x9   :  { %3364 = sst [smem:[#allocation44_spill]] %s3338_s9 }
   0xa   :  { %3365 = sst [smem:[#allocation45_spill]] %s3339_s10 }
   0xb   :  { %16 = vsyncpa [#allocation9], 0 }
   0xc   :  { %18 = vsyncpa [#allocation9 + $0x1], 0 }
   0xd   :  { %19 = vsyncpa [#allocation12], 0 }
   0xe   :  { %21 = vsyncpa [#allocation12 + $0x1], 0 }
   0xf   :  { %22 = vsyncpa [#allocation15], 0 }
  0x10   :  { %23 = vsyncpa [#allocation18], 0 }
  0x11   :  { %24 = vsyncpa [#allocation10], 0 }
  0x12   :  { %26 = vsyncpa [#allocation10 + $0x1], 0 }
  0x13   :  { %27 = vsyncpa [#allocation21], 0 }
  0x14   :  { %29 = vsyncpa [#allocation21 + $0x1], 0  ;;  %s2656_s13 = smov 0   ;;  %s2658_s14 = smov 0  }
  0x15   :  { %s2660_s15 = smov 0   ;;  %s2662_s16 = smov 0  }
  0x16   :  { %s2664_s17 = smov 0   ;;  %s2666_s18 = smov 0  }
  0x17   :  { %s2668_s19 = smov 0   ;;  %s2670_s20 = smov 0  }
  0x18   :  { %s2672_s21 = smov 0  }
  0x19 LB: > { %3366 = sst [smem:[#allocation29_spill]] %s2554_s13  ;;  %s2702_s22 = sadd.s32 4294967295, %s2586_s21   ;;  %s2586_s21 = sphi %s2672_s21, %s35_s21   ;;  %s2582_s20 = sphi %s2670_s20, %s3418_s20   ;;  %s2578_s19 = sphi %s2668_s19, %s3417_s19   ;;  %s2574_s18 = sphi %s2666_s18, %s3410_s18   ;;  %s2570_s17 = sphi %s2664_s17, %s3416_s17   ;;  %s2566_s16 = sphi %s2662_s16, %s3415_s16   ;;  %s2562_s15 = sphi %s2660_s15, %s3414_s15   ;;  %s2558_s14 = sphi %s2658_s14, %s3413_s14   ;;  %s2554_s13 = sphi %s2656_s13, %s3412_s13  }
  0x1a   : > { %3367 = sst [smem:[#allocation30_spill]] %s2574_s18  ;;  %p99_p0 = scmp.ne.s32.totalorder %s2558_s14, %s2554_s13 }
  0x1b   : > { %3368 = sst [smem:[#allocation31_spill]] %s2578_s19  ;;  %p3345_p1 = scmp.eq.s32.totalorder %s2702_s22, 0 }
  0x1c   : > { %p277_p2 = scmp.eq.s32.totalorder %s2702_s22, 1  ;;  %p1954_p3 = scmp.ge.s32.totalorder %s2586_s21, 1 }
  0x1d   : > { %p320_p4 = scmp.lt.s32.totalorder %s2586_s21, 3  ;;  %p2715_p5 = por %p99_p0, %p3345_p1 }
  0x1e   : > { %s3371_s2 = sld [smem:[#allocation38_spill]]  ;;  %s2588_s28 = smov [#allocation13]  }
  0x1f   : > { %p2719_p6 = pnand %p1954_p3, %p320_p4  ;;  %s333_s29 = sshll.u32 %s2588_s28, 4  ;;  %s334_s29 = int_to_ptr.vmem [resolvable:$true] %s333_s29 }
  0x20   : > { %s3373_s3 = sld [smem:[#allocation39_spill]]  ;;  %s3346_s26 = smov 128  }
  0x21   : > { %p2043_p7 = pneg %p2719_p6  ;;  %s3374_s4 = sld [smem:[#allocation40_spill]] }
  0x22   : > { %s2591_s8 = smov [#allocation14]   ;;  %s3375_s5 = sld [smem:[#allocation41_spill]] }
  0x23   : > { %p2730_p8 = pnand %p2043_p7, %p3345_p1  ;;  %s347_s19 = sshll.u32 %s2591_s8, 4  ;;  %s348_s19 = int_to_ptr.vmem [resolvable:$true] %s347_s19 }
  0x24   : > { %s331_s27 = sshll.u32 %s3371_s2, 4  ;;  %s3348_s2 = smov 8   ;;  %s332_s27 = int_to_ptr.hbm [resolvable:$true] %s331_s27 }
  0x25   : > { %2046 = dma.hbm_to_vmem [thread:$0]  (!%p2730_p8), %s332_s27, 256, %s334_s29, [#allocation12], %s3346_s26, %s3346_s26, %s3348_s2  }
  0x26   : > { %s345_s25 = sshll.u32 %s3373_s3, 4  ;;  %s2592_s27 = smov [#allocation16]   ;;  %s346_s25 = int_to_ptr.hbm [resolvable:$true] %s345_s25 }
  0x27   : > { %s359_s9 = sshll.u32 %s3374_s4, 4  ;;  %s361_s10 = sshll.u32 %s2592_s27, 4  ;;  %s360_s9 = int_to_ptr.hbm [resolvable:$true] %s359_s9  ;;  %s362_s10 = int_to_ptr.vmem [resolvable:$true] %s361_s10 }
  0x28   : > { %2049 = dma.hbm_to_vmem [thread:$0]  (!%p2730_p8), %s346_s25, 256, %s348_s19, [#allocation15], %s3346_s26, %s3346_s26, %s3348_s2  }
  0x29   : > { %s373_s12 = sshll.u32 %s3375_s5, 4  ;;  %s2593_s8 = smov [#allocation17]   ;;  %s374_s12 = int_to_ptr.hbm [resolvable:$true] %s373_s12 }
  0x2a   : > { %2052 = dma.hbm_to_vmem [thread:$0]  (!%p2730_p8), %s360_s9, 512, %s362_s10, [#allocation15], %s3346_s26, %s3346_s26, %s3348_s2  }
  0x2b   : > { %s375_s19 = sshll.u32 %s2593_s8, 4  ;;  %s1953_s25 = sadd.s32 4294967294, %s2586_s21   ;;  %s376_s19 = int_to_ptr.vmem [resolvable:$true] %s375_s19 }
  0x2c   : > { %2055 = dma.hbm_to_vmem [thread:$0]  (!%p2730_p8), %s374_s12, 512, %s376_s19, [#allocation18], %s3346_s26, %s3346_s26, %s3348_s2  }
  0x2d   : > { %s44_s28 = sadd.s32 1, %s2582_s20  ;;  %s56_s27 = sadd.s32 1, %s2574_s18 }
  0x2e   : > { %p45_p10 = scmp.ge.s32.totalorder %s44_s28, 2  ;;  %p63_p11 = scmp.ne.s32.totalorder %s2574_s18, %s2570_s17 }
  0x2f   : > { %p3344_p12 = scmp.eq.s32.totalorder %s2586_s21, 0  ;;  %p69_p13 = scmp.ne.s32.totalorder %s2570_s17, %s2566_s16 }
  0x30   : > { %s3420_s28 = smov (%p45_p10, %s44_s28), 0  ;;  %p2790_p7 = por %p277_p2, %p63_p11 }
  0x31   : > { %3376 = sst [smem:[#allocation32_spill]] %s3420_s28  ;;  %p2776_p3 = por %p3344_p12, %p63_p11 }
  0x32   : > { %p2782_p4 = por %p3345_p1, %p69_p13  ;;  %s51_s10 = ssub.s32 %s2582_s20, %s3420_s28 }
  0x33   : > { %p54_p8 = scmp.eq.s32.totalorder %s51_s10, 0  ;;  %p283_p10 = scmp.eq.s32.totalorder %s1953_s25, 1 }
  0x34   : > { %p2074_p9 = scmp.lt.s32.totalorder %s2586_s21, 2  ;;  %s402_s11 = sand.u32 1, %s2574_s18  }
  0x35   : > { %s2797_s12 = scalar_select %p54_p8, %s2574_s18, %s56_s27  }
  0x36   : > { %p2799_p12 = por %p283_p10, %p69_p13  ;;  %p2806_p1 = por %p283_p10, %p99_p0 }
  0x37   : > { %3380 = sst [smem:[#allocation33_spill]] %s2797_s12  ;;  %s2015_s10 = smul.u32 40, %s402_s11 }
  0x38   : > { %s3381_s8 = scalar_select %p2799_p12, 1, 0 }
  0x39   : > { %s3383_s19 = scalar_select %p2806_p1, 1, 0 }
  0x3a   : > { %3382 = sst [smem:[#allocation34_spill]] %s3381_s8  ;;  %s2011_s25 = smul.u32 40, %s2582_s20 }
  0x3b   : > { %3384 = sst [smem:[#allocation35_spill]] %s3383_s19  ;;  %p2057_p11 = pnand %p2074_p9, %p2776_p3 }
  0x3c   : > { %s3385_s0 = sld [smem:[#allocation36_spill]]  ;;  %s406_s3 = scalar_lea.vmem [#allocation8], %s2015_s10 }
  0x3d   : > { %s415_s4 = sshll.u32 %s406_s3, 4  ;;  %s403_s12 = scalar_lea.sflag [#allocation9], %s402_s11  ;;  %s416_s4 = int_to_ptr.vmem [resolvable:$true] %s415_s4 }
  0x3e   : > { %s3386_s18 = smov 8   ;;  %s3387_s9 = smov 128  }
  0x3f   : > { %s79_s19 = ssub.s32 1, %s2582_s20  ;;  %s80_s13 = ssub.s32 1, %s3420_s28 }
  0x40   : > { %s86_s8 = sadd.s32 1, %s2562_s15  ;;  %s81_s26 = ssub.s32 %s79_s19, %s80_s13 }
  0x41   : > { %p93_p0 = scmp.ne.s32.totalorder %s2562_s15, %s2558_s14  ;;  %p84_p13 = scmp.eq.s32.totalorder %s81_s26, 0 }
  0x42   : > { %s412_s2 = scalar_lea.hbm %s3385_s0, %s2011_s25  ;;  %s425_s25 = sand.u32 1, %s2586_s21  }
  0x43   : > { %s413_s5 = sshll.u32 %s412_s2, 4  ;;  %p3388_p3 = scmp.eq.s32.totalorder %s2586_s21, 0  ;;  %s414_s5 = int_to_ptr.hbm [resolvable:$true] %s413_s5 }
  0x44   : > { %2059 = dma.hbm_to_vmem [thread:$0]  (!%p2057_p11), %s414_s5, 640, %s416_s4, %s403_s12, %s3387_s9, %s3387_s9, %s3386_s18  }
  0x45   : > { %p95_p8 = por %p93_p0, %p3388_p3  ;;  %p2831_p10 = por %p277_p2, %p93_p0 }
  0x46   : > { %s2836_s3 = scalar_select %p84_p13, %s2562_s15, %s86_s8  }
  0x47   : > { %s427_s11 = sand.u32 1, %s2562_s15   ;;  %p2060_p11 = pnand %p2074_p9, %p95_p8 }
  0x48   : > { %s2016_s10 = smul.u32 40, %s427_s11  ;;  %s3390_s1 = sld [smem:[#allocation37_spill]] }
  0x49   : > { %s2012_s4 = smul.u32 40, %s79_s19  ;;  %s426_s28 = scalar_lea.sflag [#allocation12], %s425_s25 }
  0x4a   : > { %s429_s27 = scalar_lea.vmem [#allocation11], %s2016_s10  ;;  %s2850_s8 = sand.u32 (!%p2719_p6), 1, %s2570_s17  }
  0x4b   : > { %s439_s26 = sshll.u32 %s429_s27, 4  ;;  %s2017_s19 = smul.u32 (!%p2719_p6), 40, %s2850_s8  ;;  %s440_s26 = int_to_ptr.vmem [resolvable:$true] %s439_s26 }
  0x4c   : > { %451 = sbr.rel (%p2719_p6) target bundleno = 3298 (0xce2), region = 56  ;;  %s454_s11 = scalar_lea.sflag (!%p2719_p6), [#allocation9], %s2850_s8 }
  0x4d   : > { %s2856_s10 = scalar_lea.vmem (!%p2719_p6), [#allocation8], %s2017_s19 }
  0x4e   : > { %s436_s13 = scalar_lea.hbm %s3390_s1, %s2012_s4 }
  0x4f   : > { %s437_s0 = sshll.u32 %s436_s13, 4  ;;  %s438_s0 = int_to_ptr.hbm [resolvable:$true] %s437_s0 }
  0x50   : > { %2062 = dma.hbm_to_vmem [thread:$0]  (!%p2060_p11), %s438_s0, 640, %s440_s26, %s426_s28, %s3387_s9, %s3387_s9, %s3386_s18  }
  0x51   : > { %2525 = dma.done.wait (%p2782_p4), %s454_s11, 640  }
  0x52   : > { %2527 = vsyncadd (%p2782_p4), %s454_s11, 4294966656  ;;  %s463_s0 = sand.u32 1, %s2702_s22   ;;  %s3355_s18 = sand.u32 1, %s2558_s14  }
  0x53   : > { %s2866_s24 = smul.u32 40, %s3355_s18  ;;  %s464_s28 = scalar_lea.sflag [#allocation12], %s463_s0 }
  0x55   : > { %s2869_s9 = scalar_lea.vmem [#allocation11], %s2866_s24 }
  0x56   : > { %2529 = dma.done.wait (%p2715_p5), %s464_s28, 640  }
  0x57   : > { %2531 = vsyncadd (%p2715_p5), %s464_s28, 4294966656  ;;  %p3391_p2 = scmp.eq.s32.totalorder %s2702_s22, 0 }
  0x59   : > { %2533 = dma.done.wait (%p3391_p2), [#allocation12], 256   ;;  %p3392_p6 = pmov %p3391_p2 }
  0x5a   : > { %p3393_p9 = pmov %p3391_p2 }
  0x5b   : > { %2535 = vsyncadd (%p3392_p6), [#allocation12], 4294967040 }
  0x5c   : > { %2537 = dma.done.wait (%p3393_p9), [#allocation15], 768   ;;  %p3394_p4 = pmov %p3391_p2 }
  0x5d   : > { %p3395_p0 = pmov %p3391_p2 }
  0x5e   : > { %2539 = vsyncadd (%p3394_p4), [#allocation15], 4294966528 }
  0x5f   : > { %2541 = dma.done.wait (%p3395_p0), [#allocation18], 512   ;;  %p3396_p13 = pmov %p3395_p0 }
  0x60   : > { %v560_v0 = vld [vmem:[#allocation13 + $0x8] sm:$0xff]  ;;  %v619_v1 = vld [vmem:[#allocation14 + $0x8] sm:$0xff]  ;;  %v559_v2 = vld [vmem:[#allocation13] sm:$0xff]  ;;  %vm565_vm0 = vcmask 130048   ;;  %s3397_s6 = sld [smem:[#allocation42_spill]]  ;;  %s2915_s4 = scalar_lea.vmem [#allocation19], %s2017_s19 }
  0x61   : > { %2543 = vsyncadd (%p3396_p13), [#allocation18], 4294966784  ;;  %595 = vmatpush.msra.mxu0 %v560_v0  ;;  %653 = vmatpush.msra.mxu1 %v619_v1  ;;  %v618_v3 = vld [vmem:[#allocation14] sm:$0xff]  ;;  %v549_v4 = vld [vmem:[%s2856_s10] sm:$0xff]  ;;  %s2918_s5 = scalar_lea.vmem [#allocation20], %s2866_s24  ;;  %s3398_s12 = sld [smem:[#allocation31_spill]] }
  0x62   : > { %v554_v5 = vld [vmem:[%s2869_s9] sm:$0xff]  ;;  %v550_v6 = vld [vmem:[%s2856_s10 + $0x8] sm:$0xff]  ;;  %v555_v7 = vld [vmem:[%s2869_s9 + $0x8] sm:$0xff] }
  0x63   : > { %596 = vmatpush.msra.mxu0 %v559_v2  ;;  %654 = vmatpush.msra.mxu1 %v618_v3  ;;  %v551_v8 = vld [vmem:[%s2856_s10 + $0x10] sm:$0xff]  ;;  %v556_v9 = vld [vmem:[%s2869_s9 + $0x10] sm:$0xff]  ;;  %v552_v10 = vld [vmem:[%s2856_s10 + $0x18] sm:$0xff] }
  0x64   : > { %1968 = vmatmul.msk.f32.vlgmr.msra.gmra.mxu0 %vm565_vm0, %v549_v4  ;;  %1973 = vmatmul.msk.f32.vlgmr.msra.gmra.mxu1 %vm565_vm0, %v554_v5  ;;  %v557_v11 = vld [vmem:[%s2869_s9 + $0x18] sm:$0xff]  ;;  %v553_v12 = vld [vmem:[%s2856_s10 + $0x20] sm:$0xff]  ;;  %v558_v13 = vld [vmem:[%s2869_s9 + $0x20] sm:$0xff] }
  0x65   : > { %v2166_v15 = vld [vmem:[%s3336_s7] ss:$0 sm:$0xff] }
  0x66   : > { %v2165_v14 = vld [vmem:[%s3397_s6] ss:$0 sm:$0xff] }
  0x67   : > { %p1978_p5 = scmp.ne.s32.totalorder %s3398_s12, 0 }
  0x6c   : > { %1969 = vmatmul.msk.f32.gmra.mxu0 %vm565_vm0, %v550_v6  ;;  %1974 = vmatmul.msk.f32.gmra.mxu1 %vm565_vm0, %v555_v7 }
  0x74   : > { %1970 = vmatmul.msk.f32.gmra.mxu0 %vm565_vm0, %v551_v8  ;;  %1975 = vmatmul.msk.f32.gmra.mxu1 %vm565_vm0, %v556_v9 }
  0x7c   : > { %1971 = vmatmul.msk.f32.gmra.mxu0 %vm565_vm0, %v552_v10  ;;  %1976 = vmatmul.msk.f32.gmra.mxu1 %vm565_vm0, %v557_v11 }
  0x84   : > { %1972 = vmatmul.msk.f32.gmra.mxu0 %vm565_vm0, %v553_v12  ;;  %1977 = vmatmul.msk.f32.gmra.mxu1 %vm565_vm0, %v558_v13 }
  0xe1   : > { %v598_v16 = vpop.f32.mrf.mxu0  ;;  %v656_v17 = vpop.f32.mrf.mxu1 }
  0xe2   : > { %v599_v18 = vadd.f32 %v2165_v14, %v598_v16  ;;  %v657_v19 = vadd.f32 %v2166_v15, %v656_v17 }
  0xe4   : > { %613 = vst [vmem:[#allocation2 + $0x8] sm:$0xff] %v599_v18 }
  0xe5   : > { %671 = vst [vmem:[#allocation3] sm:$0xff] %v657_v19 }
  0xe9   : > { %v601_v20 = vpop.f32.mrf.mxu0  ;;  %v659_v21 = vpop.f32.mrf.mxu1 }
  0xea   : > { %v602_v22 = vadd.f32 %v2165_v14, %v601_v20  ;;  %v660_v23 = vadd.f32 %v2166_v15, %v659_v21 }
  0xec   : > { %614 = vst [vmem:[#allocation2] sm:$0xff] %v602_v22 }
  0xed   : > { %672 = vst [vmem:[#allocation3 + $0x8] sm:$0xff] %v660_v23 }
  0xf1   : > { %v604_v24 = vpop.f32.mrf.mxu0  ;;  %v662_v25 = vpop.f32.mrf.mxu1 }
  0xf2   : > { %v605_v26 = vadd.f32 %v2165_v14, %v604_v24  ;;  %v663_v27 = vadd.f32 %v2166_v15, %v662_v25 }
  0xf4   : > { %615 = vst [vmem:[#allocation2 + $0x20] sm:$0xff] %v605_v26 }
  0xf5   : > { %673 = vst [vmem:[#allocation3 + $0x20] sm:$0xff] %v663_v27 }
  0xf9   : > { %v607_v28 = vpop.f32.mrf.mxu0  ;;  %v665_v29 = vpop.f32.mrf.mxu1 }
  0xfa   : > { %v608_v30 = vadd.f32 %v2165_v14, %v607_v28  ;;  %v666_v31 = vadd.f32 %v2166_v15, %v665_v29 }
  0xfc   : > { %616 = vst [vmem:[#allocation2 + $0x10] sm:$0xff] %v608_v30 }
  0xfd   : > { %674 = vst [vmem:[#allocation3 + $0x18] sm:$0xff] %v666_v31 }
 0x101   : > { %v610_v32 = vpop.f32.mrf.mxu0  ;;  %v668_v33 = vpop.f32.mrf.mxu1  ;;  %679 = sbr.rel (%p1978_p5) target bundleno = 267 (0x10b), region = 84 }
 0x102   : > { %v611_v34 = vadd.f32 %v2165_v14, %v610_v32  ;;  %v669_v35 = vadd.f32 %v2166_v15, %v668_v33 }
 0x104   : > { %617 = vst [vmem:[#allocation2 + $0x18] sm:$0xff] %v611_v34 }
 0x105   : > { %675 = vst [vmem:[#allocation3 + $0x10] sm:$0xff] %v669_v35 }
 0x106   : > { %vm680_vm1 = vcmask 261120   ;;  %v2594_v36 = vmov 0.0  }
 0x107   : > { %681 = vst.msk [vmem:[#allocation4] sm:$0xff] %vm680_vm1, %v2594_v36 }
 0x108   : > { %682 = vst.msk [vmem:[#allocation5] sm:$0xff] %vm680_vm1, %v2594_v36 }
 0x109   : > { %683 = vst.msk [vmem:[#allocation6] sm:$0xff] %vm680_vm1, %v2594_v36 }
 0x10a   : > { %684 = vst.msk [vmem:[#allocation7] sm:$0xff] %vm680_vm1, %v2594_v36 }
 0x10b PF: > { %v2921_v37 = vld [vmem:[#allocation16 + $0x18] sm:$0xff]  ;;  %v2925_v39 = vld [vmem:[#allocation16 + $0x10] sm:$0xff]  ;;  %v2931_v41 = vld [vmem:[#allocation16 + $0x8] sm:$0xff]  ;;  %s2595_s13 = smov 32   ;;  %vm697_vm2 = vcmask 261120   ;;  %v2596_v0 = vmov 0  }
 0x10c   : > { %v2923_v38 = vld [vmem:[#allocation17 + $0x18] sm:$0xff]  ;;  %713 = vmatpush.msra.mxu2 %v2921_v37  ;;  %v2929_v40 = vld [vmem:[#allocation17 + $0x10] sm:$0xff]  ;;  %v2933_v42 = vld [vmem:[#allocation17 + $0x8] sm:$0xff]  ;;  %2167 = vset.pattern.permute.xlu2 %v2596_v0  ;;  %s3399_s27 = sld [smem:[#allocation31_spill]]  ;;  %s2597_s0 = smov 64  }
 0x10d   : > { %814 = vmatpush.msra.mxu3 %v2923_v38  ;;  %v2937_v44 = vld [vmem:[#allocation16] sm:$0xff]  ;;  %v688_v49 = vld [vmem:[#allocation2 + $0x8] sm:$0xff]  ;;  %2168 = vset.pattern.permute.xlu0 %v2596_v0  ;;  %s3400_s10 = sld [smem:[#allocation43_spill]]  ;;  %s2598_s28 = smov 96  }
 0x10e   : > { %714 = vmatpush.msra.mxu2 %v2925_v39  ;;  %v2939_v45 = vld [vmem:[#allocation17] sm:$0xff]  ;;  %2169 = vset.pattern.permute.xlu1 %v2596_v0  ;;  %s1714_s18 = scalar_lea.sflag [#allocation10], %s2850_s8 }
 0x10f   : > { %815 = vmatpush.msra.mxu3 %v2929_v40  ;;  %v690_v43 = vld [vmem:[#allocation5] sm:$0xff]  ;;  %v2944_v46 = vld [vmem:[#allocation4] sm:$0xff] }
 0x110   : > { %743 = vrot.lane.b32.xlu1 %v690_v43, %s2595_s13  ;;  %715 = vmatpush.msra.mxu2 %v2931_v41  ;;  %v2946_v47 = vld [vmem:[#allocation6] sm:$0xff] }
 0x111   : > { %816 = vmatpush.msra.mxu3 %v2933_v42  ;;  %v792_v48 = vld [vmem:[#allocation7] sm:$0xff]  ;;  %v790_v52 = vld [vmem:[#allocation3 + $0x10] sm:$0xff] }
 0x112   : > { %716 = vmatpush.msra.mxu2 %v2937_v44  ;;  %s2978_s26 = smul.u32 5, %s3399_s27 }
 0x113   : > { %817 = vmatpush.msra.mxu3 %v2939_v45  ;;  %1979 = vmatmul.msk.f32.vlgmr.msra.gmra.mxu2 %vm697_vm2, %v2944_v46  ;;  %v2983_v24 = vld [vmem:[%s3400_s10] sm:$0xff] }
 0x114   : > { %1981 = vmatmul.msk.f32.vlgmr.msra.gmra.mxu3 %vm697_vm2, %v2946_v47  ;;  %918 = vmatpush.msrb.mxu2 %v2921_v37  ;;  %v691_v25 = vstv %s2978_s26  ;;  %s687_s24 = ssub.s32 9, %s2978_s26  ;;  %s891_s9 = sadd.s32 1, %s2978_s26 }
 0x115   : > { %1020 = vmatpush.msrb.mxu3 %v2923_v38  ;;  %vm692_vm11 = vcmp.gt.s32.totalorder %v2983_v24, %v691_v25  ;;  %v793_v36 = vstv %s687_s24  ;;  %s892_s22 = ssub.s32 8, %s2978_s26  ;;  %s1097_s23 = sadd.s32 2, %s2978_s26 }
 0x116   : > { %919 = vmatpush.msrb.mxu2 %v2925_v39  ;;  %v763_v26 = vsel %vm692_vm11, 1, %v2596_v0  ;;  %vm794_vm12 = vcmp.gt.s32.totalorder %v2983_v24, %v793_v36  ;;  %v897_v36 = vstv %s891_s9  ;;  %s1098_s30 = ssub.s32 7, %s2978_s26  ;;  %s1303_s25 = sadd.s32 3, %s2978_s26 }
 0x117   : > { %1021 = vmatpush.msrb.mxu3 %v2929_v40  ;;  %v864_v43 = vsel %vm794_vm12, 1, %v2596_v0  ;;  %s1304_s12 = ssub.s32 6, %s2978_s26  ;;  %s1509_s19 = sadd.s32 4, %s2978_s26 }
 0x118   : > { %844 = vrot.lane.b32.xlu1 %v792_v48, %s2595_s13  ;;  %920 = vmatpush.msrb.mxu2 %v2931_v41  ;;  %s1510_s11 = ssub.s32 5, %s2978_s26  ;;  %s3402_s24 = sld [smem:[#allocation45_spill]] }
 0x119   : > { %1022 = vmatpush.msrb.mxu3 %v2933_v42 }
 0x11a   : > { %921 = vmatpush.msrb.mxu2 %v2937_v44 }
 0x11b   : > { %1023 = vmatpush.msrb.mxu3 %v2939_v45 }
 0x11c   : > { %1124 = vmatpush.msra.mxu2 %v2921_v37 }
 0x11d   : > { %1226 = vmatpush.msra.mxu3 %v2923_v38 }
 0x11e   : > { %1125 = vmatpush.msra.mxu2 %v2925_v39 }
 0x11f   : > { %1227 = vmatpush.msra.mxu3 %v2929_v40 }
 0x120   : > { %1126 = vmatpush.msra.mxu2 %v2931_v41 }
 0x121   : > { %1228 = vmatpush.msra.mxu3 %v2933_v42 }
 0x122   : > { %1127 = vmatpush.msra.mxu2 %v2937_v44 }
 0x123   : > { %1229 = vmatpush.msra.mxu3 %v2939_v45 }
 0x182   : > { %v744_v27 = vpop.permute.xlu1 %743 }
 0x18a   : > { %v845_v31 = vpop.permute.xlu1 %844 }
 0x196   : > { %v718_v50 = vpop.f32.mrf.mxu2 }
 0x197   : > { %v721_v51 = vadd.f32 %v718_v50, %v688_v49  ;;  %v819_v53 = vpop.f32.mrf.mxu3 }
 0x198   : > { %v822_v54 = vadd.f32 %v819_v53, %v790_v52 }
 0x199   : > { %2170 = vtanh.f32 %v721_v51  ;;  %v1980_v57 = vmul.f32 -1.442695, %v721_v51 }
 0x19a   : > { %2172 = vtanh.f32 %v822_v54  ;;  %v1982_v58 = vmul.f32 -1.442695, %v822_v54 }
 0x19b   : > { %2174 = vpow2.f32 %v1980_v57 }
 0x19c   : > { %2176 = vpow2.f32 %v1982_v58 }
 0x19f   : > { %v2171_v55 = vpop.eup %2170 }
 0x1a0   : > { %748 = vrot.lane.b32.xlu0 %v2171_v55, %s2595_s13  ;;  %v2173_v56 = vpop.eup %2172 }
 0x1a1   : > { %v2175_v59 = vpop.eup %2174 }
 0x1a2   : > { %v725_v60 = vadd.f32 1.0, %v2175_v59  ;;  %v2177_v61 = vpop.eup %2176 }
 0x1a3   : > { %v826_v62 = vadd.f32 1.0, %v2177_v61 }
 0x1a4   : > { %2178 = vrcp.f32 %v725_v60  ;;  %v737_v8 = vand.u32 2147483648, %v725_v60  ;;  %vm731_vm4 = vweird.f32 %v725_v60  ;;  %v735_v9 = vand.u32 2147483647, %v725_v60 }
 0x1a5   : > { %2180 = vrcp.f32 %v826_v62  ;;  %vm832_vm7 = vweird.f32 %v826_v62  ;;  %v838_v17 = vand.u32 2147483648, %v826_v62  ;;  %v836_v18 = vand.u32 2147483647, %v826_v62 }
 0x1a6   : > { %v738_v12 = vor.u32 1.1754944e-38, %v737_v8  ;;  %vm736_vm6 = vcmp.eq.f32.partialorder %v735_v9, 8.507059e+37  ;;  %v894_v8 = vld [vmem:[#allocation2] sm:$0xff] }
 0x1a7   : > { %v839_v20 = vor.u32 1.1754944e-38, %v838_v17  ;;  %vm837_vm10 = vcmp.eq.f32.partialorder %v836_v18, 8.507059e+37 }
 0x1a8   : > { %849 = vrot.lane.b32.xlu0 %v2173_v56, %s2595_s13 }
 0x1aa   : > { %v2179_v63 = vpop.eup %2178 }
 0x1ab   : > { %v727_v1 = vmul.f32 %v2179_v63, %v725_v60  ;;  %v2181_v3 = vpop.eup %2180  ;;  %vm732_vm3 = vweird.f32 %v2179_v63 }
 0x1ac   : > { %v828_v5 = vmul.f32 %v2181_v3, %v826_v62  ;;  %vm733_vm5 = vmor %vm731_vm4, %vm732_vm3  ;;  %vm833_vm8 = vweird.f32 %v2181_v3 }
 0x1ad   : > { %v728_v2 = vsub.f32 1.0, %v727_v1  ;;  %vm834_vm9 = vmor %vm832_vm7, %vm833_vm8  ;;  %vm898_vm8 = vcmp.gt.s32.totalorder %v2983_v24, %v897_v36 }
 0x1ae   : > { %v829_v7 = vsub.f32 1.0, %v828_v5 }
 0x1af   : > { %v729_v4 = vmul.f32 %v2179_v63, %v728_v2 }
 0x1b0   : > { %v830_v11 = vmul.f32 %v2181_v3, %v829_v7 }
 0x1b1   : > { %v730_v6 = vadd.f32 %v2179_v63, %v729_v4  ;;  %v996_v4 = vld [vmem:[#allocation3 + $0x18] sm:$0xff] }
 0x1b2   : > { %v831_v15 = vadd.f32 %v2181_v3, %v830_v11 }
 0x1b3   : > { %v734_v10 = vsel %vm733_vm5, %v2179_v63, %v730_v6 }
 0x1b4   : > { %v739_v13 = vsel %vm736_vm6, %v738_v12, %v734_v10  ;;  %v835_v19 = vsel %vm834_vm9, %v2181_v3, %v831_v15 }
 0x1b5   : > { %v840_v21 = vsel %vm837_vm10, %v839_v20, %v835_v19  ;;  %v746_v28 = vmul.f32 %v744_v27, %v739_v13 }
 0x1b6   : > { %v847_v32 = vmul.f32 %v845_v31, %v840_v21 }
 0x212   : > { %v749_v14 = vpop.permute.xlu0 %748 }
 0x213   : > { %v751_v16 = vmul.f32 %v749_v14, %v739_v13 }
 0x215   : > { %753 = vrot.lane.b32.xlu2 %v751_v16, %s2595_s13 }
 0x21a   : > { %v850_v22 = vpop.permute.xlu0 %849 }
 0x21b   : > { %v852_v23 = vmul.f32 %v850_v22, %v840_v21 }
 0x21d   : > { %854 = vrot.lane.b32.xlu2 %v852_v23, %s2595_s13 }
 0x225   : > { %765 = vperm.xlu2 %2167, %v763_v26  }
 0x22d   : > { %870 = vrot.lane.b32.xlu2 %v2946_v47, %s2597_s0 }
 0x26f   : > { %v754_v29 = vpop.permute.xlu2 %753 }
 0x270   : > { %v756_v30 = vadd.f32 %v754_v29, %v746_v28 }
 0x272   : > { %2182 = vtanh.f32 %v756_v30 }
 0x277   : > { %v855_v33 = vpop.permute.xlu2 %854 }
 0x278   : > { %v2183_v34 = vpop.eup %2182  ;;  %v857_v35 = vadd.f32 %v855_v33, %v847_v32 }
 0x279   : > { %759 = vrot.lane.b32.xlu0 %v2183_v34, %s2595_s13 }
 0x27a   : > { %2184 = vtanh.f32 %v857_v35 }
 0x27f   : > { %v2996_v48 = vpop.permute.xlu2 %765 }
 0x280   : > { %v2185_v47 = vpop.eup %2184  ;;  %vm767_vm13 = vcmp.eq.s32.totalorder %v2996_v48, 1 }
 0x281   : > { %860 = vrot.lane.b32.xlu1 %v2185_v47, %s2595_s13  ;;  %866 = vperm.xlu0 %2168, %v864_v43   ;;  %v768_v49 = vsel %vm767_vm13, %v756_v30, %v744_v27 }
 0x287   : > { %v871_v51 = vpop.permute.xlu2 %870 }
 0x289   : > { %769 = vrot.lane.b32.xlu1 %v2944_v46, %s2597_s0  ;;  %780 = vrot.lane.b32.xlu0 %v768_v49, %s2598_s28 }
 0x2eb   : > { %v760_v50 = vpop.permute.xlu0 %759 }
 0x2ec   : > { %v3007_v57 = vmul.f32 %v760_v50, %v739_v13 }
 0x2f3   : > { %v861_v52 = vpop.permute.xlu1 %860  ;;  %v867_v53 = vpop.permute.xlu0 %866 }
 0x2f4   : > { %v863_v54 = vmul.f32 %v861_v52, %v840_v21  ;;  %vm868_vm14 = vcmp.eq.s32.totalorder %v867_v53, 1  ;;  %v968_v52 = vsel %vm898_vm8, 1, %v2596_v0 }
 0x2f5   : > { %v869_v60 = vsel %vm868_vm14, %v857_v35, %v845_v31 }
 0x2f6   : > { %v873_v55 = vsel %vm868_vm14, %v863_v54, %v871_v51  ;;  %v3004_v56 = vsel %vm868_vm14, %v863_v54, 0.0 }
 0x2f7   : > { %876 = vrot.lane.b32.xlu2 %v873_v55, %s2597_s0 }
 0x2fb   : > { %v770_v58 = vpop.permute.xlu1 %769  ;;  %v781_v59 = vpop.permute.xlu0 %780 }
 0x2fc   : > { %783 = vst.msk [vmem:[#allocation5] sm:$0xff] %vm697_vm2, %v781_v59  ;;  %v772_v46 = vsel %vm767_vm13, %v3007_v57, %v770_v58 }
 0x2fd   : > { %775 = vrot.lane.b32.xlu1 %v772_v46, %s2597_s0 }
 0x303   : > { %v896_v61 = vld [vmem:[#allocation5] sm:$0xff] }
 0x305   : > { %881 = vrot.lane.b32.xlu1 %v869_v60, %s2598_s28 }
 0x30d   : > { %948 = vrot.lane.b32.xlu1 %v896_v61, %s2595_s13 }
 0x351   : > { %v877_v62 = vpop.permute.xlu2 %876 }
 0x352   : > { %879 = vst.msk [vmem:[#allocation6] sm:$0xff] %vm697_vm2, %v877_v62 }
 0x359   : > { %v3017_v63 = vld [vmem:[#allocation6] sm:$0xff] }
 0x35a   : > { %1987 = vmatmul.msk.f32.vlgmr.msrb.gmra.mxu3 %vm697_vm2, %v3017_v63 }
 0x35b   : > { %1432 = vmatpush.msrb.mxu3 %v2923_v38 }
 0x35d   : > { %1433 = vmatpush.msrb.mxu3 %v2929_v40 }
 0x35f   : > { %1434 = vmatpush.msrb.mxu3 %v2933_v42 }
 0x361   : > { %1435 = vmatpush.msrb.mxu3 %v2939_v45 }
 0x36f   : > { %v776_v1 = vpop.permute.xlu1 %775 }
 0x370   : > { %778 = vst.msk [vmem:[#allocation4] sm:$0xff] %vm697_vm2, %v776_v1 }
 0x377   : > { %v882_v2 = vpop.permute.xlu1 %881  ;;  %v3026_v3 = vld [vmem:[#allocation4] sm:$0xff] }
 0x378   : > { %884 = vst.msk [vmem:[#allocation7] sm:$0xff] %vm697_vm2, %v882_v2  ;;  %1984 = vmatmul.msk.f32.vlgmr.msrb.gmra.mxu2 %vm697_vm2, %v3026_v3 }
 0x379   : > { %1330 = vmatpush.msrb.mxu2 %v2921_v37 }
 0x37b   : > { %1331 = vmatpush.msrb.mxu2 %v2925_v39 }
 0x37d   : > { %1332 = vmatpush.msrb.mxu2 %v2931_v41 }
 0x37f   : > { %1333 = vmatpush.msrb.mxu2 %v2937_v44  ;;  %v998_v37 = vld [vmem:[#allocation7] sm:$0xff]  ;;  %v949_v53 = vpop.permute.xlu1 %948 }
 0x3dd   : > { %v1025_v5 = vpop.f32.mrf.mxu3 }
 0x3de   : > { %v1028_v6 = vadd.f32 %v1025_v5, %v996_v4  ;;  %v999_v4 = vstv %s892_s22 }
 0x3df   : > { %vm1000_vm10 = vcmp.gt.s32.totalorder %v2983_v24, %v999_v4 }
 0x3e0   : > { %2186 = vtanh.f32 %v1028_v6  ;;  %v1988_v39 = vmul.f32 -1.442695, %v1028_v6  ;;  %v1070_v5 = vsel %vm1000_vm10, 1, %v2596_v0 }
 0x3e6   : > { %v2187_v7 = vpop.eup %2186 }
 0x3e7   : > { %1055 = vrot.lane.b32.xlu0 %v2187_v7, %s2595_s13 }
 0x3fb   : > { %v923_v9 = vpop.f32.mrf.mxu2 }
 0x3fc   : > { %v926_v10 = vadd.f32 %v923_v9, %v894_v8 }
 0x3fe   : > { %2188 = vtanh.f32 %v926_v10  ;;  %v1985_v41 = vmul.f32 -1.442695, %v926_v10 }
 0x3ff   : > { %2190 = vpow2.f32 %v1988_v39 }
 0x400   : > { %2192 = vpow2.f32 %v1985_v41 }
 0x404   : > { %v2189_v11 = vpop.eup %2188 }
 0x405   : > { %953 = vrot.lane.b32.xlu2 %v2189_v11, %s2595_s13  ;;  %v2191_v12 = vpop.eup %2190 }
 0x406   : > { %v1032_v13 = vadd.f32 1.0, %v2191_v12  ;;  %v2193_v14 = vpop.eup %2192 }
 0x407   : > { %v930_v15 = vadd.f32 1.0, %v2193_v14 }
 0x408   : > { %2194 = vrcp.f32 %v1032_v13  ;;  %v1044_v25 = vand.u32 2147483648, %v1032_v13  ;;  %vm1038_vm0 = vweird.f32 %v1032_v13  ;;  %v1042_v26 = vand.u32 2147483647, %v1032_v13 }
 0x409   : > { %2196 = vrcp.f32 %v930_v15  ;;  %v942_v33 = vand.u32 2147483648, %v930_v15  ;;  %vm936_vm5 = vweird.f32 %v930_v15  ;;  %v940_v35 = vand.u32 2147483647, %v930_v15 }
 0x40a   : > { %v1045_v29 = vor.u32 1.1754944e-38, %v1044_v25  ;;  %vm1043_vm3 = vcmp.eq.f32.partialorder %v1042_v26, 8.507059e+37  ;;  %v1202_v25 = vld [vmem:[#allocation3 + $0x20] sm:$0xff] }
 0x40b   : > { %v943_v47 = vor.u32 1.1754944e-38, %v942_v33  ;;  %vm941_vm7 = vcmp.eq.f32.partialorder %v940_v35, 8.507059e+37 }
 0x40d   : > { %1050 = vrot.lane.b32.xlu2 %v998_v37, %s2595_s13 }
 0x40e   : > { %v2195_v16 = vpop.eup %2194 }
 0x40f   : > { %v1034_v17 = vmul.f32 %v2195_v16, %v1032_v13  ;;  %v2197_v18 = vpop.eup %2196  ;;  %vm1039_vm15 = vweird.f32 %v2195_v16 }
 0x410   : > { %v932_v20 = vmul.f32 %v2197_v18, %v930_v15  ;;  %vm1040_vm1 = vmor %vm1038_vm0, %vm1039_vm15  ;;  %vm937_vm4 = vweird.f32 %v2197_v18 }
 0x411   : > { %v1035_v19 = vsub.f32 1.0, %v1034_v17  ;;  %vm938_vm6 = vmor %vm936_vm5, %vm937_vm4 }
 0x412   : > { %v933_v22 = vsub.f32 1.0, %v932_v20  ;;  %v1100_v20 = vld [vmem:[#allocation2 + $0x20] sm:$0xff] }
 0x413   : > { %v1036_v21 = vmul.f32 %v2195_v16, %v1035_v19 }
 0x414   : > { %v934_v27 = vmul.f32 %v2197_v18, %v933_v22 }
 0x415   : > { %v1037_v23 = vadd.f32 %v2195_v16, %v1036_v21 }
 0x416   : > { %v935_v30 = vadd.f32 %v2197_v18, %v934_v27 }
 0x417   : > { %v1041_v28 = vsel %vm1040_vm1, %v2195_v16, %v1037_v23 }
 0x418   : > { %v1046_v32 = vsel %vm1043_vm3, %v1045_v29, %v1041_v28  ;;  %v939_v43 = vsel %vm938_vm6, %v2197_v18, %v935_v30 }
 0x419   : > { %v944_v49 = vsel %vm941_vm7, %v943_v47, %v939_v43 }
 0x41a   : > { %v951_v46 = vmul.f32 %v949_v53, %v944_v49 }
 0x459   : > { %v1056_v31 = vpop.permute.xlu0 %1055 }
 0x45a   : > { %v1058_v34 = vmul.f32 %v1056_v31, %v1046_v32 }
 0x45c   : > { %1060 = vrot.lane.b32.xlu1 %v1058_v34, %s2595_s13 }
 0x45f   : > { %v954_v50 = vpop.permute.xlu2 %953 }
 0x460   : > { %v956_v51 = vmul.f32 %v954_v50, %v944_v49 }
 0x462   : > { %958 = vrot.lane.b32.xlu0 %v956_v51, %s2595_s13 }
 0x464   : > { %970 = vperm.xlu1 %2169, %v968_v52  }
 0x467   : > { %v1051_v54 = vpop.permute.xlu2 %1050 }
 0x468   : > { %v1053_v55 = vmul.f32 %v1051_v54, %v1046_v32 }
 0x46c   : > { %1076 = vrot.lane.b32.xlu1 %v3017_v63, %s2597_s0 }
 0x4ce   : > { %v1061_v58 = vpop.permute.xlu1 %1060 }
 0x4cf   : > { %v1063_v59 = vadd.f32 %v1061_v58, %v1053_v55 }
 0x4d1   : > { %2198 = vtanh.f32 %v1063_v59 }
 0x4d4   : > { %v959_v60 = vpop.permute.xlu0 %958 }
 0x4d5   : > { %v961_v61 = vadd.f32 %v959_v60, %v951_v46 }
 0x4d6   : > { %v3045_v62 = vpop.permute.xlu1 %970 }
 0x4d7   : > { %v2199_v1 = vpop.eup %2198  ;;  %2200 = vtanh.f32 %v961_v61  ;;  %vm972_vm9 = vcmp.eq.s32.totalorder %v3045_v62, 1  ;;  %v2251_v62 = vld [vmem:[%s3400_s10] sm:$0xff] }
 0x4d8   : > { %1066 = vrot.lane.b32.xlu0 %v2199_v1, %s2595_s13  ;;  %v973_v63 = vsel %vm972_vm9, %v961_v61, %v949_v53 }
 0x4d9   : > { %985 = vrot.lane.b32.xlu1 %v973_v63, %s2598_s28 }
 0x4dd   : > { %v2201_v2 = vpop.eup %2200 }
 0x4de   : > { %964 = vrot.lane.b32.xlu2 %v2201_v2, %s2595_s13  ;;  %v1077_v7 = vpop.permute.xlu1 %1076 }
 0x4e0   : > { %974 = vrot.lane.b32.xlu0 %v3026_v3, %s2597_s0 }
 0x4e6   : > { %1072 = vperm.xlu2 %2167, %v1070_v5  }
 0x538   : > { %v965_v6 = vpop.permute.xlu2 %964 }
 0x539   : > { %v3062_v3 = vmul.f32 %v965_v6, %v944_v49  ;;  %v1103_v6 = vstv %s1097_s23  ;;  %s3401_s23 = sld [smem:[#allocation44_spill]] }
 0x53a   : > { %vm1104_vm6 = vcmp.gt.s32.totalorder %v2983_v24, %v1103_v6 }
 0x53f   : > { %s2452_s26 = scalar_lea.hbm %s3401_s23, 80 }
 0x540   : > { %v1073_v8 = vpop.permute.xlu2 %1072 }
 0x541   : > { %vm1074_vm11 = vcmp.eq.s32.totalorder %v1073_v8, 1 }
 0x542   : > { %v1075_v13 = vsel %vm1074_vm11, %v1063_v59, %v1051_v54 }
 0x54a   : > { %v1067_v9 = vpop.permute.xlu0 %1066 }
 0x54b   : > { %v1069_v10 = vmul.f32 %v1067_v9, %v1046_v32  ;;  %v986_v11 = vpop.permute.xlu1 %985 }
 0x54c   : > { %988 = vst.msk [vmem:[#allocation5] sm:$0xff] %vm697_vm2, %v986_v11 }
 0x54d   : > { %v1079_v37 = vsel %vm1074_vm11, %v1069_v10, %v1077_v7  ;;  %v3059_v39 = vsel %vm1074_vm11, %v1069_v10, 0.0  ;;  %v1174_v7 = vsel %vm1104_vm6, 1, %v2596_v0 }
 0x54e   : > { %1082 = vrot.lane.b32.xlu0 %v1079_v37, %s2597_s0 }
 0x552   : > { %v975_v41 = vpop.permute.xlu0 %974 }
 0x553   : > { %v977_v12 = vsel %vm972_vm9, %v3062_v3, %v975_v41  ;;  %v1102_v14 = vld [vmem:[#allocation5] sm:$0xff] }
 0x554   : > { %980 = vrot.lane.b32.xlu2 %v977_v12, %s2597_s0 }
 0x55c   : > { %1087 = vrot.lane.b32.xlu2 %v1075_v13, %s2598_s28 }
 0x564   : > { %1154 = vrot.lane.b32.xlu2 %v1102_v14, %s2595_s13 }
 0x5ae   : > { %v981_v15 = vpop.permute.xlu2 %980 }
 0x5af   : > { %983 = vst.msk [vmem:[#allocation4] sm:$0xff] %vm697_vm2, %v981_v15 }
 0x5b6   : > { %v1088_v16 = vpop.permute.xlu2 %1087  ;;  %v3071_v17 = vld [vmem:[#allocation4] sm:$0xff] }
 0x5b7   : > { %1090 = vst.msk [vmem:[#allocation7] sm:$0xff] %vm697_vm2, %v1088_v16  ;;  %1990 = vmatmul.msk.f32.vlgmr.msra.gmra.mxu2 %vm697_vm2, %v3071_v17 }
 0x5be   : > { %v1204_v26 = vld [vmem:[#allocation7] sm:$0xff]  ;;  %v1155_v8 = vpop.permute.xlu2 %1154 }
 0x5c0   : > { %v1083_v18 = vpop.permute.xlu0 %1082 }
 0x5c1   : > { %1085 = vst.msk [vmem:[#allocation6] sm:$0xff] %vm697_vm2, %v1083_v18 }
 0x5c8   : > { %v3077_v19 = vld [vmem:[#allocation6] sm:$0xff] }
 0x5c9   : > { %1993 = vmatmul.msk.f32.vlgmr.msra.gmra.mxu3 %vm697_vm2, %v3077_v19 }
 0x5ca   : > { %1637 = vmatpush.msra.mxu3 %v2923_v38 }
 0x5cc   : > { %1638 = vmatpush.msra.mxu3 %v2929_v40 }
 0x5ce   : > { %1639 = vmatpush.msra.mxu3 %v2933_v42 }
 0x5d0   : > { %1640 = vmatpush.msra.mxu3 %v2939_v45 }
 0x63a   : > { %v1129_v21 = vpop.f32.mrf.mxu2 }
 0x63b   : > { %v1132_v22 = vadd.f32 %v1129_v21, %v1100_v20 }
 0x63d   : > { %2202 = vtanh.f32 %v1132_v22  ;;  %v1991_v40 = vmul.f32 -1.442695, %v1132_v22 }
 0x643   : > { %v2203_v23 = vpop.eup %2202 }
 0x644   : > { %1159 = vrot.lane.b32.xlu0 %v2203_v23, %s2595_s13 }
 0x64c   : > { %v1231_v27 = vpop.f32.mrf.mxu3  ;;  %1256 = vrot.lane.b32.xlu0 %v1204_v26, %s2595_s13 }
 0x64d   : > { %v1234_v28 = vadd.f32 %v1231_v27, %v1202_v25 }
 0x64f   : > { %2204 = vtanh.f32 %v1234_v28  ;;  %v1994_v29 = vmul.f32 -1.442695, %v1234_v28 }
 0x650   : > { %2206 = vpow2.f32 %v1991_v40 }
 0x655   : > { %v2205_v38 = vpop.eup %2204 }
 0x656   : > { %1261 = vrot.lane.b32.xlu1 %v2205_v38, %s2595_s13  ;;  %v2207_v42 = vpop.eup %2206 }
 0x657   : > { %v1136_v45 = vadd.f32 1.0, %v2207_v42 }
 0x659   : > { %2208 = vrcp.f32 %v1136_v45  ;;  %v1148_v43 = vand.u32 2147483648, %v1136_v45  ;;  %vm1142_vm14 = vweird.f32 %v1136_v45  ;;  %v1146_v47 = vand.u32 2147483647, %v1136_v45 }
 0x65a   : > { %2210 = vpow2.f32 %v1994_v29 }
 0x65b   : > { %v1149_v51 = vor.u32 1.1754944e-38, %v1148_v43  ;;  %vm1147_vm0 = vcmp.eq.f32.partialorder %v1146_v47, 8.507059e+37  ;;  %v1408_v47 = vld [vmem:[#allocation3 + $0x8] sm:$0xff] }
 0x65f   : > { %v2209_v30 = vpop.eup %2208 }
 0x660   : > { %v1138_v31 = vmul.f32 %v2209_v30, %v1136_v45  ;;  %v2211_v32 = vpop.eup %2210  ;;  %vm1143_vm12 = vweird.f32 %v2209_v30 }
 0x661   : > { %v1238_v34 = vadd.f32 1.0, %v2211_v32  ;;  %vm1144_vm15 = vmor %vm1142_vm14, %vm1143_vm12 }
 0x662   : > { %v1139_v33 = vsub.f32 1.0, %v1138_v31 }
 0x663   : > { %2212 = vrcp.f32 %v1238_v34  ;;  %v1250_v60 = vand.u32 2147483648, %v1238_v34  ;;  %vm1244_vm3 = vweird.f32 %v1238_v34  ;;  %v1248_v61 = vand.u32 2147483647, %v1238_v34 }
 0x664   : > { %v1140_v35 = vmul.f32 %v2209_v30, %v1139_v33 }
 0x665   : > { %v1251_v63 = vor.u32 1.1754944e-38, %v1250_v60  ;;  %vm1249_vm5 = vcmp.eq.f32.partialorder %v1248_v61, 8.507059e+37 }
 0x666   : > { %v1141_v36 = vadd.f32 %v2209_v30, %v1140_v35  ;;  %v1306_v35 = vld [vmem:[#allocation2 + $0x10] sm:$0xff] }
 0x668   : > { %v1145_v50 = vsel %vm1144_vm15, %v2209_v30, %v1141_v36 }
 0x669   : > { %v2213_v49 = vpop.eup %2212  ;;  %v1150_v54 = vsel %vm1147_vm0, %v1149_v51, %v1145_v50 }
 0x66a   : > { %v1240_v52 = vmul.f32 %v2213_v49, %v1238_v34  ;;  %vm1245_vm1 = vweird.f32 %v2213_v49  ;;  %v1157_v41 = vmul.f32 %v1155_v8, %v1150_v54 }
 0x66b   : > { %vm1246_vm4 = vmor %vm1244_vm3, %vm1245_vm1 }
 0x66c   : > { %v1241_v58 = vsub.f32 1.0, %v1240_v52 }
 0x66e   : > { %v1242_v59 = vmul.f32 %v2213_v49, %v1241_v58 }
 0x670   : > { %v1243_v46 = vadd.f32 %v2213_v49, %v1242_v59 }
 0x672   : > { %v1247_v1 = vsel %vm1246_vm4, %v2213_v49, %v1243_v46 }
 0x673   : > { %v1252_v2 = vsel %vm1249_vm5, %v1251_v63, %v1247_v1 }
 0x6b6   : > { %v1160_v53 = vpop.permute.xlu0 %1159 }
 0x6b7   : > { %v1162_v55 = vmul.f32 %v1160_v53, %v1150_v54 }
 0x6b9   : > { %1164 = vrot.lane.b32.xlu1 %v1162_v55, %s2595_s13 }
 0x6be   : > { %v1257_v9 = vpop.permute.xlu0 %1256 }
 0x6bf   : > { %v1259_v10 = vmul.f32 %v1257_v9, %v1252_v2 }
 0x6c8   : > { %v1262_v4 = vpop.permute.xlu1 %1261 }
 0x6c9   : > { %v1264_v5 = vmul.f32 %v1262_v4, %v1252_v2 }
 0x6cb   : > { %1266 = vrot.lane.b32.xlu2 %v1264_v5, %s2595_s13 }
 0x6d3   : > { %1176 = vperm.xlu2 %2167, %v1174_v7  }
 0x6db   : > { %1282 = vrot.lane.b32.xlu2 %v3077_v19, %s2597_s0  ;;  %v1205_v19 = vstv %s1098_s30  ;;  %s1744_s30 = ssub.s32 1, %s3399_s27 }
 0x6dc   : > { %vm1206_vm8 = vcmp.gt.s32.totalorder %v2983_v24, %v1205_v19 }
 0x6dd   : > { %v1276_v20 = vsel %vm1206_vm8, 1, %v2596_v0 }
 0x725   : > { %v1267_v11 = vpop.permute.xlu2 %1266 }
 0x726   : > { %v1269_v37 = vadd.f32 %v1267_v11, %v1259_v10 }
 0x728   : > { %2214 = vtanh.f32 %v1269_v37 }
 0x72b   : > { %v1165_v12 = vpop.permute.xlu1 %1164 }
 0x72c   : > { %v1167_v13 = vadd.f32 %v1165_v12, %v1157_v41  ;;  %v1309_v12 = vstv %s1303_s25  ;;  %s1732_s25 = sshll.u32 %s2915_s4, 4  ;;  %s1733_s25 = int_to_ptr.vmem [resolvable:$true] %s1732_s25 }
 0x72d   : > { %v3095_v14 = vpop.permute.xlu2 %1176  ;;  %vm1310_vm0 = vcmp.gt.s32.totalorder %v2983_v24, %v1309_v12 }
 0x72e   : > { %v2215_v15 = vpop.eup %2214  ;;  %2216 = vtanh.f32 %v1167_v13  ;;  %vm1178_vm7 = vcmp.eq.s32.totalorder %v3095_v14, 1 }
 0x72f   : > { %1272 = vrot.lane.b32.xlu1 %v2215_v15, %s2595_s13  ;;  %v1179_v16 = vsel %vm1178_vm7, %v1167_v13, %v1155_v8 }
 0x730   : > { %1191 = vrot.lane.b32.xlu2 %v1179_v16, %s2598_s28  ;;  %v1380_v16 = vsel %vm1310_vm0, 1, %v2596_v0 }
 0x734   : > { %v2217_v18 = vpop.eup %2216 }
 0x735   : > { %1170 = vrot.lane.b32.xlu0 %v2217_v18, %s2595_s13  ;;  %v1283_v21 = vpop.permute.xlu2 %1282 }
 0x737   : > { %1180 = vrot.lane.b32.xlu1 %v3071_v17, %s2597_s0 }
 0x73d   : > { %1278 = vperm.xlu0 %2168, %v1276_v20  }
 0x78a   : > { %v1192_v22 = vpop.permute.xlu2 %1191 }
 0x78b   : > { %1194 = vst.msk [vmem:[#allocation5] sm:$0xff] %vm697_vm2, %v1192_v22 }
 0x792   : > { %v1308_v29 = vld [vmem:[#allocation5] sm:$0xff] }
 0x7a1   : > { %v1273_v23 = vpop.permute.xlu1 %1272 }
 0x7a2   : > { %v1275_v17 = vmul.f32 %v1273_v23, %v1252_v2 }
 0x7a7   : > { %v1171_v25 = vpop.permute.xlu0 %1170 }
 0x7a8   : > { %v3109_v26 = vmul.f32 %v1171_v25, %v1150_v54 }
 0x7a9   : > { %v1181_v27 = vpop.permute.xlu1 %1180 }
 0x7aa   : > { %v1183_v28 = vsel %vm1178_vm7, %v3109_v26, %v1181_v27  ;;  %v1184_v48 = vsel %vm1178_vm7, %v3109_v26, 0.0 }
 0x7ab   : > { %1186 = vrot.lane.b32.xlu0 %v1183_v28, %s2597_s0 }
 0x7af   : > { %v1279_v38 = vpop.permute.xlu0 %1278 }
 0x7b0   : > { %vm1280_vm10 = vcmp.eq.s32.totalorder %v1279_v38, 1 }
 0x7b1   : > { %v1285_v40 = vsel %vm1280_vm10, %v1275_v17, %v1283_v21  ;;  %v1281_v42 = vsel %vm1280_vm10, %v1269_v37, %v1257_v9  ;;  %v3115_v45 = vsel %vm1280_vm10, %v1275_v17, 0.0 }
 0x7b2   : > { %1288 = vrot.lane.b32.xlu1 %v1285_v40, %s2597_s0 }
 0x7b3   : > { %1293 = vrot.lane.b32.xlu0 %v1281_v42, %s2598_s28 }
 0x7bb   : > { %1360 = vrot.lane.b32.xlu0 %v1308_v29, %s2595_s13 }
 0x81d   : > { %v1187_v30 = vpop.permute.xlu0 %1186 }
 0x81e   : > { %1189 = vst.msk [vmem:[#allocation4] sm:$0xff] %vm697_vm2, %v1187_v30 }
 0x824   : > { %v1289_v31 = vpop.permute.xlu1 %1288 }
 0x825   : > { %1291 = vst.msk [vmem:[#allocation6] sm:$0xff] %vm697_vm2, %v1289_v31  ;;  %v1294_v32 = vpop.permute.xlu0 %1293  ;;  %v3122_v33 = vld [vmem:[#allocation4] sm:$0xff] }
 0x826   : > { %1296 = vst.msk [vmem:[#allocation7] sm:$0xff] %vm697_vm2, %v1294_v32  ;;  %1996 = vmatmul.msk.f32.vlgmr.msrb.gmra.mxu2 %vm697_vm2, %v3122_v33 }
 0x82c   : > { %v3127_v34 = vld [vmem:[#allocation6] sm:$0xff] }
 0x82d   : > { %1999 = vmatmul.msk.f32.vlgmr.msrb.gmra.mxu3 %vm697_vm2, %v3127_v34  ;;  %v1410_v53 = vld [vmem:[#allocation7] sm:$0xff]  ;;  %v1361_v28 = vpop.permute.xlu0 %1360 }
 0x8a9   : > { %v1335_v36 = vpop.f32.mrf.mxu2 }
 0x8aa   : > { %v1338_v43 = vadd.f32 %v1335_v36, %v1306_v35  ;;  %v1411_v35 = vstv %s1304_s12 }
 0x8ab   : > { %vm1412_vm6 = vcmp.gt.s32.totalorder %v2983_v24, %v1411_v35 }
 0x8ac   : > { %2218 = vtanh.f32 %v1338_v43  ;;  %v1997_v59 = vmul.f32 -1.442695, %v1338_v43  ;;  %v1482_v36 = vsel %vm1412_vm6, 1, %v2596_v0 }
 0x8b0   : > { %v1437_v49 = vpop.f32.mrf.mxu3 }
 0x8b1   : > { %v1440_v50 = vadd.f32 %v1437_v49, %v1408_v47 }
 0x8b2   : > { %v2219_v51 = vpop.eup %2218 }
 0x8b3   : > { %2220 = vtanh.f32 %v1440_v50  ;;  %1365 = vrot.lane.b32.xlu1 %v2219_v51, %s2595_s13  ;;  %v2000_v54 = vmul.f32 -1.442695, %v1440_v50 }
 0x8b5   : > { %2222 = vpow2.f32 %v2000_v54 }
 0x8b9   : > { %v2221_v52 = vpop.eup %2220 }
 0x8ba   : > { %1467 = vrot.lane.b32.xlu2 %v2221_v52, %s2595_s13 }
 0x8bb   : > { %1462 = vrot.lane.b32.xlu1 %v1410_v53, %s2595_s13  ;;  %v2223_v55 = vpop.eup %2222 }
 0x8bc   : > { %v1444_v58 = vadd.f32 1.0, %v2223_v55 }
 0x8be   : > { %2224 = vrcp.f32 %v1444_v58  ;;  %v1456_v5 = vand.u32 2147483648, %v1444_v58  ;;  %vm1450_vm12 = vweird.f32 %v1444_v58  ;;  %v1454_v7 = vand.u32 2147483647, %v1444_v58 }
 0x8bf   : > { %2226 = vpow2.f32 %v1997_v59 }
 0x8c0   : > { %v1457_v9 = vor.u32 1.1754944e-38, %v1456_v5  ;;  %vm1455_vm15 = vcmp.eq.f32.partialorder %v1454_v7, 8.507059e+37 }
 0x8c4   : > { %v2225_v46 = vpop.eup %2224 }
 0x8c5   : > { %v1446_v60 = vmul.f32 %v2225_v46, %v1444_v58  ;;  %v2227_v61 = vpop.eup %2226  ;;  %vm1451_vm11 = vweird.f32 %v2225_v46 }
 0x8c6   : > { %v1342_v1 = vadd.f32 1.0, %v2227_v61  ;;  %vm1452_vm14 = vmor %vm1450_vm12, %vm1451_vm11 }
 0x8c7   : > { %v1447_v63 = vsub.f32 1.0, %v1446_v60 }
 0x8c8   : > { %2228 = vrcp.f32 %v1342_v1  ;;  %v1354_v19 = vand.u32 2147483648, %v1342_v1  ;;  %vm1348_vm3 = vweird.f32 %v1342_v1  ;;  %v1352_v20 = vand.u32 2147483647, %v1342_v1 }
 0x8c9   : > { %v1448_v2 = vmul.f32 %v2225_v46, %v1447_v63  ;;  %v1519_v63 = vld [vmem:[#allocation16 + $0x10] sm:$0xff] }
 0x8ca   : > { %v1355_v22 = vor.u32 1.1754944e-38, %v1354_v19  ;;  %vm1353_vm5 = vcmp.eq.f32.partialorder %v1352_v20, 8.507059e+37 }
 0x8cb   : > { %v1449_v4 = vadd.f32 %v2225_v46, %v1448_v2  ;;  %v2250_v2 = vld [vmem:[#allocation16 + $0x8] sm:$0xff] }
 0x8cd   : > { %v1453_v8 = vsel %vm1452_vm14, %v2225_v46, %v1449_v4 }
 0x8ce   : > { %v2229_v6 = vpop.eup %2228  ;;  %v1458_v11 = vsel %vm1455_vm15, %v1457_v9, %v1453_v8 }
 0x8cf   : > { %v1344_v10 = vmul.f32 %v2229_v6, %v1342_v1  ;;  %vm1349_vm1 = vweird.f32 %v2229_v6  ;;  %v1520_v1 = vld [vmem:[#allocation16 + $0x18] sm:$0xff] }
 0x8d0   : > { %vm1350_vm4 = vmor %vm1348_vm3, %vm1349_vm1  ;;  %1536 = vmatpush.msra.mxu2 %v1520_v1 }
 0x8d1   : > { %v1345_v13 = vsub.f32 1.0, %v1344_v10 }
 0x8d2   : > { %1537 = vmatpush.msra.mxu2 %v1519_v63 }
 0x8d3   : > { %v1346_v15 = vmul.f32 %v2229_v6, %v1345_v13 }
 0x8d4   : > { %1538 = vmatpush.msra.mxu2 %v2250_v2 }
 0x8d5   : > { %v1347_v18 = vadd.f32 %v2229_v6, %v1346_v15 }
 0x8d6   : > { %1539 = vmatpush.msra.mxu2 %v2937_v44  ;;  %v1613_v44 = vld [vmem:[#allocation3] sm:$0xff] }
 0x8d7   : > { %v1351_v21 = vsel %vm1350_vm4, %v2229_v6, %v1347_v18 }
 0x8d8   : > { %v1356_v23 = vsel %vm1353_vm5, %v1355_v22, %v1351_v21 }
 0x8d9   : > { %v1363_v17 = vmul.f32 %v1361_v28, %v1356_v23 }
 0x914   : > { %v1468_v37 = vpop.permute.xlu2 %1467 }
 0x915   : > { %v1470_v41 = vmul.f32 %v1468_v37, %v1458_v11  ;;  %v1512_v37 = vld [vmem:[#allocation2 + $0x18] sm:$0xff] }
 0x917   : > { %1472 = vrot.lane.b32.xlu0 %v1470_v41, %s2595_s13 }
 0x91f   : > { %1382 = vperm.xlu0 %2168, %v1380_v16  }
 0x925   : > { %v1366_v25 = vpop.permute.xlu1 %1365 }
 0x926   : > { %v1368_v27 = vmul.f32 %v1366_v25, %v1356_v23 }
 0x927   : > { %1488 = vrot.lane.b32.xlu0 %v3127_v34, %s2597_s0 }
 0x928   : > { %1370 = vrot.lane.b32.xlu2 %v1368_v27, %s2595_s13 }
 0x92d   : > { %v1463_v42 = vpop.permute.xlu1 %1462 }
 0x92e   : > { %v1465_v29 = vmul.f32 %v1463_v42, %v1458_v11 }
 0x982   : > { %v1371_v38 = vpop.permute.xlu2 %1370 }
 0x983   : > { %v1373_v40 = vadd.f32 %v1371_v38, %v1363_v17 }
 0x985   : > { %2230 = vtanh.f32 %v1373_v40 }
 0x989   : > { %v1473_v30 = vpop.permute.xlu0 %1472 }
 0x98a   : > { %v1475_v31 = vadd.f32 %v1473_v30, %v1465_v29 }
 0x98b   : > { %v2231_v32 = vpop.eup %2230 }
 0x98c   : > { %2232 = vtanh.f32 %v1475_v31  ;;  %1376 = vrot.lane.b32.xlu1 %v2231_v32, %s2595_s13 }
 0x991   : > { %v3144_v34 = vpop.permute.xlu0 %1382 }
 0x992   : > { %v2233_v43 = vpop.eup %2232  ;;  %vm1384_vm8 = vcmp.eq.s32.totalorder %v3144_v34, 1 }
 0x993   : > { %1478 = vrot.lane.b32.xlu2 %v2233_v43, %s2595_s13  ;;  %v1385_v47 = vsel %vm1384_vm8, %v1373_v40, %v1361_v28 }
 0x994   : > { %1397 = vrot.lane.b32.xlu0 %v1385_v47, %s2598_s28  ;;  %1484 = vperm.xlu1 %2169, %v1482_v36  }
 0x999   : > { %v1489_v50 = vpop.permute.xlu0 %1488 }
 0x99b   : > { %1386 = vrot.lane.b32.xlu2 %v3122_v33, %s2597_s0 }
 0x9ed   : > { %v1479_v49 = vpop.permute.xlu2 %1478 }
 0x9ee   : > { %v1481_v55 = vmul.f32 %v1479_v49, %v1458_v11 }
 0x9f5   : > { %v1387_v53 = vpop.permute.xlu2 %1386 }
 0x9fe   : > { %v1377_v51 = vpop.permute.xlu1 %1376 }
 0x9ff   : > { %v3154_v52 = vmul.f32 %v1377_v51, %v1356_v23 }
 0xa01   : > { %v1389_v54 = vsel %vm1384_vm8, %v3154_v52, %v1387_v53 }
 0xa02   : > { %1392 = vrot.lane.b32.xlu1 %v1389_v54, %s2597_s0 }
 0xa06   : > { %v1398_v58 = vpop.permute.xlu0 %1397  ;;  %v1485_v59 = vpop.permute.xlu1 %1484 }
 0xa07   : > { %1400 = vst.msk [vmem:[#allocation5] sm:$0xff] %vm697_vm2, %v1398_v58  ;;  %vm1486_vm10 = vcmp.eq.s32.totalorder %v1485_v59, 1 }
 0xa08   : > { %v1491_v46 = vsel %vm1486_vm10, %v1481_v55, %v1489_v50  ;;  %v1487_v33 = vsel %vm1486_vm10, %v1475_v31, %v1463_v42  ;;  %v3161_v60 = vsel %vm1486_vm10, %v1481_v55, 0.0 }
 0xa09   : > { %1494 = vrot.lane.b32.xlu2 %v1491_v46, %s2597_s0  ;;  %v1515_v46 = vstv %s1509_s19  ;;  %s2014_s19 = smul.u32 40, %s1744_s30 }
 0xa0a   : > { %1499 = vrot.lane.b32.xlu1 %v1487_v33, %s2598_s28  ;;  %vm1516_vm5 = vcmp.gt.s32.totalorder %v2983_v24, %v1515_v46 }
 0xa0b   : > { %v1586_v33 = vsel %vm1516_vm5, 1, %v2596_v0  ;;  %s1750_s9 = scalar_lea.hbm %s3402_s24, %s2014_s19 }
 0xa0e   : > { %v1514_v61 = vld [vmem:[#allocation5] sm:$0xff] }
 0xa12   : > { %1566 = vrot.lane.b32.xlu1 %v1514_v61, %s2595_s13  ;;  %v978_v61 = vsel %vm972_vm9, %v3062_v3, 0.0 }
 0xa63   : > { %v1495_v4 = vpop.permute.xlu2 %1494 }
 0xa64   : > { %1497 = vst.msk [vmem:[#allocation6] sm:$0xff] %vm697_vm2, %v1495_v4 }
 0xa6b   : > { %v3168_v5 = vld [vmem:[#allocation6] sm:$0xff] }
 0xa6c   : > { %2005 = vmatmul.msk.f32.vlgmr.msra.gmra.mxu3 %vm697_vm2, %v3168_v5 }
 0xa74   : > { %v1393_v6 = vpop.permute.xlu1 %1392 }
 0xa75   : > { %1395 = vst.msk [vmem:[#allocation4] sm:$0xff] %vm697_vm2, %v1393_v6 }
 0xa7c   : > { %v1500_v7 = vpop.permute.xlu1 %1499  ;;  %v3173_v8 = vld [vmem:[#allocation4] sm:$0xff] }
 0xa7d   : > { %1502 = vst.msk [vmem:[#allocation7] sm:$0xff] %vm697_vm2, %v1500_v7  ;;  %2002 = vmatmul.msk.f32.vlgmr.msra.gmra.mxu2 %vm697_vm2, %v3173_v8 }
 0xa84   : > { %v1615_v15 = vld [vmem:[#allocation7] sm:$0xff]  ;;  %v1567_v1 = vpop.permute.xlu1 %1566 }
 0xaef   : > { %v1642_v9 = vpop.f32.mrf.mxu3 }
 0xaf0   : > { %v1645_v10 = vadd.f32 %v1642_v9, %v1613_v44  ;;  %v1616_v9 = vstv %s1510_s11 }
 0xaf1   : > { %vm1617_vm9 = vcmp.gt.s32.totalorder %v2251_v62, %v1616_v9 }
 0xaf2   : > { %2234 = vtanh.f32 %v1645_v10  ;;  %v2006_v18 = vmul.f32 -1.442695, %v1645_v10 }
 0xaf8   : > { %v2235_v11 = vpop.eup %2234 }
 0xaf9   : > { %1672 = vrot.lane.b32.xlu0 %v2235_v11, %s2595_s13 }
 0xb00   : > { %v1541_v41 = vpop.f32.mrf.mxu2 }
 0xb01   : > { %v1544_v12 = vadd.f32 %v1541_v41, %v1512_v37  ;;  %v773_v41 = vsel %vm767_vm13, %v3007_v57, 0.0  ;;  %v1390_v57 = vsel %vm1384_vm8, %v3154_v52, 0.0 }
 0xb03   : > { %2236 = vtanh.f32 %v1544_v12  ;;  %v2003_v16 = vmul.f32 -1.442695, %v1544_v12 }
 0xb05   : > { %2238 = vpow2.f32 %v2003_v16 }
 0xb06   : > { %2240 = vpow2.f32 %v2006_v18 }
 0xb09   : > { %v2237_v13 = vpop.eup %2236 }
 0xb0a   : > { %1571 = vrot.lane.b32.xlu2 %v2237_v13, %s2595_s13 }
 0xb0b   : > { %v2239_v19 = vpop.eup %2238 }
 0xb0c   : > { %v1548_v20 = vadd.f32 1.0, %v2239_v19  ;;  %v2241_v21 = vpop.eup %2240 }
 0xb0d   : > { %v1649_v22 = vadd.f32 1.0, %v2241_v21 }
 0xb0e   : > { %2242 = vrcp.f32 %v1548_v20  ;;  %v1560_v29 = vand.u32 2147483648, %v1548_v20  ;;  %vm1554_vm12 = vweird.f32 %v1548_v20  ;;  %v1558_v30 = vand.u32 2147483647, %v1548_v20 }
 0xb0f   : > { %2244 = vrcp.f32 %v1649_v22  ;;  %v1661_v50 = vand.u32 2147483648, %v1649_v22  ;;  %vm1655_vm1 = vweird.f32 %v1649_v22  ;;  %v1659_v51 = vand.u32 2147483647, %v1649_v22 }
 0xb10   : > { %v1561_v35 = vor.u32 1.1754944e-38, %v1560_v29  ;;  %vm1559_vm15 = vcmp.eq.f32.partialorder %v1558_v30, 8.507059e+37 }
 0xb11   : > { %v1662_v54 = vor.u32 1.1754944e-38, %v1661_v50  ;;  %vm1660_vm4 = vcmp.eq.f32.partialorder %v1659_v51, 8.507059e+37 }
 0xb12   : > { %1667 = vrot.lane.b32.xlu2 %v1615_v15, %s2595_s13 }
 0xb14   : > { %v2243_v23 = vpop.eup %2242 }
 0xb15   : > { %v1550_v25 = vmul.f32 %v2243_v23, %v1548_v20  ;;  %v2245_v27 = vpop.eup %2244  ;;  %vm1555_vm11 = vweird.f32 %v2243_v23 }
 0xb16   : > { %v1651_v17 = vmul.f32 %v2245_v27, %v1649_v22  ;;  %vm1556_vm14 = vmor %vm1554_vm12, %vm1555_vm11  ;;  %vm1656_vm0 = vweird.f32 %v2245_v27 }
 0xb17   : > { %v1551_v28 = vsub.f32 1.0, %v1550_v25  ;;  %vm1657_vm3 = vmor %vm1655_vm1, %vm1656_vm0 }
 0xb18   : > { %v1652_v40 = vsub.f32 1.0, %v1651_v17 }
 0xb19   : > { %v1552_v38 = vmul.f32 %v2243_v23, %v1551_v28 }
 0xb1a   : > { %v1653_v31 = vmul.f32 %v2245_v27, %v1652_v40 }
 0xb1b   : > { %v1553_v42 = vadd.f32 %v2243_v23, %v1552_v38 }
 0xb1c   : > { %v1654_v47 = vadd.f32 %v2245_v27, %v1653_v31 }
 0xb1d   : > { %v1557_v32 = vsel %vm1556_vm14, %v2243_v23, %v1553_v42 }
 0xb1e   : > { %v3181_v36 = vsel %vm1559_vm15, %v1561_v35, %v1557_v32  ;;  %v1658_v53 = vsel %vm1657_vm3, %v2245_v27, %v1654_v47 }
 0xb1f   : > { %v1663_v58 = vsel %vm1660_vm4, %v1662_v54, %v1658_v53  ;;  %v1569_v63 = vmul.f32 %v1567_v1, %v3181_v36 }
 0xb64   : > { %v1572_v43 = vpop.permute.xlu2 %1571 }
 0xb65   : > { %v1574_v49 = vmul.f32 %v1572_v43, %v3181_v36 }
 0xb67   : > { %1576 = vrot.lane.b32.xlu0 %v1574_v49, %s2595_s13 }
 0xb6b   : > { %v1673_v55 = vpop.permute.xlu0 %1672 }
 0xb6c   : > { %v1675_v59 = vmul.f32 %v1673_v55, %v1663_v58  ;;  %v1668_v4 = vpop.permute.xlu2 %1667 }
 0xb6d   : > { %v1670_v6 = vmul.f32 %v1668_v4, %v1663_v58 }
 0xb6e   : > { %1677 = vrot.lane.b32.xlu1 %v1675_v59, %s2595_s13 }
 0xb76   : > { %1588 = vperm.xlu1 %2169, %v1586_v33  }
 0xb7e   : > { %1693 = vrot.lane.b32.xlu1 %v3168_v5, %s2597_s0 }
 0xb86   : > { %990 = vrot.lane.b32.xlu1 %v978_v61, %s2597_s0 }
 0xb8e   : > { %1298 = vrot.lane.b32.xlu1 %v3115_v45, %s2597_s0  ;;  %v1687_v45 = vsel %vm1617_vm9, 1, %v2596_v0 }
 0xbd9   : > { %v1577_v2 = vpop.permute.xlu0 %1576 }
 0xbda   : > { %v1579_v24 = vadd.f32 %v1577_v2, %v1569_v63 }
 0xbdc   : > { %2246 = vtanh.f32 %v1579_v24 }
 0xbe0   : > { %v1678_v7 = vpop.permute.xlu1 %1677 }
 0xbe1   : > { %v1680_v5 = vadd.f32 %v1678_v7, %v1670_v6 }
 0xbe2   : > { %v2247_v44 = vpop.eup %2246 }
 0xbe3   : > { %2248 = vtanh.f32 %v1680_v5  ;;  %1582 = vrot.lane.b32.xlu2 %v2247_v44, %s2595_s13 }
 0xbe8   : > { %v1589_v3 = vpop.permute.xlu1 %1588 }
 0xbe9   : > { %v2249_v10 = vpop.eup %2248  ;;  %vm1590_vm6 = vcmp.eq.s32.totalorder %v1589_v3, 1 }
 0xbea   : > { %1683 = vrot.lane.b32.xlu0 %v2249_v10, %s2595_s13  ;;  %v1591_v11 = vsel %vm1590_vm6, %v1579_v24, %v1567_v1  ;;  %s2013_s13 = smul.u32 40, %s3399_s27 }
 0xbeb   : > { %1689 = vperm.xlu2 %2167, %v1687_v45  }
 0xbf0   : > { %v1694_v37 = vpop.permute.xlu1 %1693 }
 0xbf2   : > { %1592 = vrot.lane.b32.xlu0 %v3173_v8, %s2597_s0 }
 0xbf3   : > { %785 = vrot.lane.b32.xlu2 %v773_v41, %s2597_s0 }
 0xbf8   : > { %v991_v12 = vpop.permute.xlu1 %990 }
 0xbf9   : > { %1986 = vst.msk [vmem:[%s2915_s4 + $0x8] sm:$0xff] %vm697_vm2, %v991_v12 }
 0xbfa   : > { %886 = vrot.lane.b32.xlu0 %v3004_v56, %s2597_s0 }
 0xbfb   : > { %1092 = vrot.lane.b32.xlu2 %v3059_v39, %s2597_s0 }
 0xc00   : > { %v1299_v0 = vpop.permute.xlu1 %1298 }
 0xc01   : > { %1995 = vst.msk [vmem:[%s2918_s5 + $0x10] sm:$0xff] %vm697_vm2, %v1299_v0 }
 0xc02   : > { %1196 = vrot.lane.b32.xlu0 %v1184_v48, %s2597_s0 }
 0xc03   : > { %1402 = vrot.lane.b32.xlu2 %v1390_v57, %s2597_s0 }
 0xc0a   : > { %1504 = vrot.lane.b32.xlu0 %v3161_v60, %s2597_s0 }
 0xc3d   : > { %v1583_v56 = vpop.permute.xlu2 %1582 }
 0xc3e   : > { %v1585_v39 = vmul.f32 %v1583_v56, %v3181_v36 }
 0xc40   : > { %v1596_v8 = vsel %vm1590_vm6, %v1585_v39, 0.0 }
 0xc41   : > { %1608 = vrot.lane.b32.xlu1 %v1596_v8, %s2597_s0 }
 0xc45   : > { %v1690_v14 = vpop.permute.xlu2 %1689 }
 0xc46   : > { %vm1691_vm13 = vcmp.eq.s32.totalorder %v1690_v14, 1 }
 0xc47   : > { %v1692_v21 = vsel %vm1691_vm13, %v1680_v5, %v1668_v4 }
 0xc49   : > { %1603 = vrot.lane.b32.xlu1 %v1591_v11, %s2598_s28 }
 0xc4d   : > { %v786_v26 = vpop.permute.xlu2 %785 }
 0xc4e   : > { %788 = vst.msk [vmem:[%s2915_s4] sm:$0xff] %vm697_vm2, %v786_v26 }
 0xc55   : > { %v1093_v34 = vpop.permute.xlu2 %1092 }
 0xc56   : > { %1989 = vst.msk [vmem:[%s2918_s5 + $0x18] sm:$0xff] %vm697_vm2, %v1093_v34 }
 0xc5c   : > { %v1684_v52 = vpop.permute.xlu0 %1683 }
 0xc5d   : > { %v1686_v13 = vmul.f32 %v1684_v52, %v1663_v58  ;;  %v1403_v60 = vpop.permute.xlu2 %1402 }
 0xc5e   : > { %1998 = vst.msk [vmem:[%s2915_s4 + $0x18] sm:$0xff] %vm697_vm2, %v1403_v60 }
 0xc5f   : > { %v1697_v15 = vsel %vm1691_vm13, %v1686_v13, 0.0  ;;  %v1696_v19 = vsel %vm1691_vm13, %v1686_v13, %v1694_v37 }
 0xc60   : > { %1709 = vrot.lane.b32.xlu2 %v1697_v15, %s2597_s0 }
 0xc64   : > { %v1593_v16 = vpop.permute.xlu0 %1592 }
 0xc65   : > { %v1595_v18 = vsel %vm1590_vm6, %v1585_v39, %v1593_v16 }
 0xc66   : > { %1598 = vrot.lane.b32.xlu0 %v1595_v18, %s2597_s0 }
 0xc68   : > { %1699 = vrot.lane.b32.xlu2 %v1696_v19, %s2597_s0  ;;  %s1731_s0 = scalar_lea.hbm %s3401_s23, %s2013_s13 }
 0xc69   : > { %s1734_s12 = sshll.u32 %s1731_s0, 4  ;;  %s1735_s12 = int_to_ptr.hbm [resolvable:$true] %s1734_s12 }
 0xc6a   : > { %s2446_s1 = sshra.s32 %s1735_s12, 4  ;;  %s2447_s1 = int_to_ptr.hbm [resolvable:$true] %s2446_s1 }
 0xc6b   : > { %s2448_s6 = scalar_lea.hbm %s2447_s1, 40  ;;  %p2453_p2 = scmp.lt.s32.totalorder %s2447_s1, %s3401_s23 }
 0xc6c   : > { %v887_v20 = vpop.permute.xlu0 %886  ;;  %p2449_p3 = scmp.ne.s32.totalorder %s2447_s1, %s2448_s6  ;;  %p2454_p6 = scmp.lt.s32.totalorder %s2452_s26, %s2448_s6 }
 0xc6d   : > { %1983 = vst.msk [vmem:[%s2918_s5 + $0x20] sm:$0xff] %vm697_vm2, %v887_v20 }
 0xc6e   : > { %1704 = vrot.lane.b32.xlu0 %v1692_v21, %s2598_s28  ;;  %p2450_p8 = pnand %p2449_p3, %p2790_p7  ;;  %p2455_p9 = por %p2454_p6, %p2453_p2 }
 0xc70   : > { %p2451_p11 = pneg %p2450_p8 }
 0xc72   : > { %p2456_p4 = pnand %p2455_p9, %p2451_p11 }
 0xc74   : > { %v1197_v22 = vpop.permute.xlu0 %1196 }
 0xc75   : > { %1992 = vst.msk [vmem:[%s2915_s4 + $0x10] sm:$0xff] %vm697_vm2, %v1197_v22 }
 0xc7c   : > { %v1505_v23 = vpop.permute.xlu0 %1504 }
 0xc7d   : > { %2001 = vst.msk [vmem:[%s2918_s5 + $0x8] sm:$0xff] %vm697_vm2, %v1505_v23 }
 0xcb3   : > { %v1609_v25 = vpop.permute.xlu1 %1608 }
 0xcb4   : > { %2004 = vst.msk [vmem:[%s2915_s4 + $0x20] sm:$0xff] %vm697_vm2, %v1609_v25 }
 0xcb5   : > { %2459 = shalt.err (!%p2456_p4)
}
 0xcb6   : > { %s2599_s8 = smov 128   ;;  %s2600_s4 = smov 8  }
 0xcb7   : > { %2039 = dma.vmem_to_hbm [thread:$0]  (%p2790_p7), %s1733_s25, 640, %s1735_s12, %s1714_s18, %s2599_s8, %s2599_s8, %s2600_s4  }
 0xcb8   : > { %s1751_s30 = sshll.u32 %s2918_s5, 4  ;;  %s1753_s19 = sshll.u32 %s1750_s9, 4  ;;  %s1752_s30 = int_to_ptr.vmem [resolvable:$true] %s1751_s30  ;;  %s1754_s19 = int_to_ptr.hbm [resolvable:$true] %s1753_s19 }
 0xcb9   : > { %s3403_s1 = sand.u32 1, %s2558_s14   ;;  %s2474_s28 = sshra.s32 %s1754_s19, 4  ;;  %s2475_s28 = int_to_ptr.hbm [resolvable:$true] %s2474_s28 }
 0xcba   : > { %v1710_v27 = vpop.permute.xlu2 %1709  ;;  %s1719_s6 = scalar_lea.sflag [#allocation21], %s3403_s1  ;;  %s2476_s11 = scalar_lea.hbm %s2475_s28, 40 }
 0xcbb   : > { %1712 = vst.msk [vmem:[%s2918_s5] sm:$0xff] %vm697_vm2, %v1710_v27  ;;  %v1604_v28 = vpop.permute.xlu1 %1603  ;;  %p2477_p0 = scmp.ne.s32.totalorder %s2475_s28, %s2476_s11  ;;  %s2480_s25 = scalar_lea.hbm %s3402_s24, 80 }
 0xcbc   : > { %1606 = vst.msk [vmem:[#allocation5] sm:$0xff] %vm697_vm2, %v1604_v28  ;;  %p2481_p7 = scmp.lt.s32.totalorder %s2475_s28, %s3402_s24  ;;  %p2482_p3 = scmp.lt.s32.totalorder %s2480_s25, %s2476_s11 }
 0xcbd   : > { %p2478_p13 = pnand %p2477_p0, %p2831_p10 }
 0xcbe   : > { %p2483_p8 = por %p2482_p3, %p2481_p7 }
 0xcbf   : > { %p2479_p5 = pneg %p2478_p13 }
 0xcc1   : > { %p2484_p11 = pnand %p2483_p8, %p2479_p5 }
 0xcc3   : > { %2487 = shalt.err (!%p2484_p11)
}
 0xcc4   : > { %2040 = dma.vmem_to_hbm [thread:$0]  (%p2831_p10), %s1752_s30, 640, %s1754_s19, %s1719_s6, %s2599_s8, %s2599_s8, %s2600_s4   ;;  %v1700_v17 = vpop.permute.xlu2 %1699 }
 0xcc5   : > { %1702 = vst.msk [vmem:[#allocation6] sm:$0xff] %vm697_vm2, %v1700_v17 }
 0xcd8   : > { %v1599_v38 = vpop.permute.xlu0 %1598 }
 0xcd9   : > { %1601 = vst.msk [vmem:[#allocation4] sm:$0xff] %vm697_vm2, %v1599_v38 }
 0xce0   : > { %v1705_v40 = vpop.permute.xlu0 %1704 }
 0xce1   : > { %1707 = vst.msk [vmem:[#allocation7] sm:$0xff] %vm697_vm2, %v1705_v40 }
 0xce2 PF: > { %s1768_s27 = sand.u32 1, %s2566_s16   ;;  %p3405_p2 = scmp.ge.s32.totalorder %s2586_s21, 2 }
 0xce3   : > { %s1769_s2 = scalar_lea.sflag [#allocation10], %s1768_s27 }
 0xce4   : > { %p2064_p6 = pnand %p3405_p2, %p2799_p12 }
 0xce6   : > { %p2065_p9 = pneg %p2064_p6 }
 0xce8   : > { %2545 = dma.done.wait (%p2065_p9), %s1769_s2, 640  }
 0xce9   : > { %2547 = vsyncadd (%p2065_p9), %s1769_s2, 4294966656  ;;  %s3406_s13 = sld [smem:[#allocation29_spill]]  ;;  %p3408_p10 = pmov %p3405_p2 }
 0xceb   : > { %p2067_p4 = pnand %p3408_p10, %p2806_p1 }
 0xced   : > { %p2068_p0 = pneg %p2067_p4 }
 0xcef   : > { %s1778_s22 = sand.u32 1, %s3406_s13  }
 0xcf0   : > { %s1779_s0 = scalar_lea.sflag [#allocation21], %s1778_s22 }
 0xcf1   : > { %2549 = dma.done.wait (%p2068_p0), %s1779_s0, 640  }
 0xcf2   : > { %2551 = vsyncadd (%p2068_p0), %s1779_s0, 4294966656  ;;  %s35_s21 = sadd.s32 1, %s2586_s21   ;;  %s3409_s8 = sld [smem:[#allocation30_spill]] }
 0xcf3   : > { %p32_p13 = scmp.ge.s32.totalorder %s35_s21, 4   ;;  %s3410_s18 = sld [smem:[#allocation33_spill]] }
 0xcf4   : > { %s3411_s4 = sld [smem:[#allocation32_spill]]  ;;  %s3412_s13 = smov %s2558_s14 }
 0xcf5   : > { %s3413_s14 = smov %s2562_s15  ;;  %s3414_s15 = smov %s2836_s3 }
 0xcf6   : > { %s3415_s16 = smov %s2570_s17  ;;  %s3417_s19 = smov %s2582_s20 }
 0xcf7   :  { %34 = sbr.rel (!%p32_p13) target bundleno = 25 (0x19), region = 170 }
 0xcf8   : > { %s3416_s17 = smov %s3409_s8 }
 0xcfa   : > { %s3418_s20 = smov %s3411_s4 }
 0xcfc   :  { %1785 = vsyncpa [#allocation9], 1 }
 0xcfd   :  { %1787 = vsyncpa [#allocation9 + $0x1], 1 }
 0xcfe   :  { %1788 = vsyncpa [#allocation12], 1 }
 0xcff   :  { %1790 = vsyncpa [#allocation12 + $0x1], 1 }
 0xd00   :  { %1791 = vsyncpa [#allocation15], 1 }
 0xd01   :  { %1792 = vsyncpa [#allocation18], 1 }
 0xd02   :  { %1793 = vsyncpa [#allocation10], 1 }
 0xd03   :  { %1795 = vsyncpa [#allocation10 + $0x1], 1 }
 0xd04   :  { %1796 = vsyncpa [#allocation21], 1 }
 0xd05   :  { %1798 = vsyncpa [#allocation21 + $0x1], 1 }

</bundles_post_ra>
